<compile_context>
chip_gen: v5e
topology: v5e:2x2
jax: 0.10.0
libtpu: 0.0.40
codegen_flags: <defaults>
</compile_context>

<pallas_src>
import functools

import jax
import jax.numpy as jnp
from jax.experimental import pallas as pl
from jax.experimental.pallas import tpu as pltpu

LN_EPS = 1e-5

# Row-tile cap: a (TI, N, C) f32 block (double buffered) stays well inside the v7x
# 64 MiB VMEM at production sizes (N<=768, C<=128); v5e/v6e have 128 MiB physical.
_ROW_TILE_CAP = 32
# Raised scoped-VMEM limit (<= v7x physical 64 MiB). Re-derive together with the
# block sizes if tiles are enlarged for v5e/v6e.
_VMEM_LIMIT = 48 * 1024 * 1024


# ----------------------------------------------------------------------------
# Small helpers
# ----------------------------------------------------------------------------
def _row_tile(n, cap=_ROW_TILE_CAP):
    """Largest tile <= cap dividing n that is sublane friendly (multiple of 8)."""
    if n <= cap:
        return n
    for t in range(cap, 0, -1):
        if n % t == 0 and t % 8 == 0:
            return t
    return n


def _col_tile(n):
    """Lane-side tile: full n unless n is a multiple of 128 (then a 128-multiple)."""
    if n % 128 != 0:
        return n
    for t in (512, 384, 256, 128):
        if t <= n and n % t == 0:
            return t
    return n


def _full_spec(x):
    nd = x.ndim
    return pl.BlockSpec(x.shape, lambda *_: (0,) * nd)


def _cparams(sem):
    return pltpu.CompilerParams(dimension_semantics=sem,
                                vmem_limit_bytes=_VMEM_LIMIT)


def _layer_norm(x, gamma, beta):
    mean = jnp.mean(x, axis=-1, keepdims=True)
    var = jnp.mean(jnp.square(x - mean), axis=-1, keepdims=True)
    return (x - mean) * jax.lax.rsqrt(var + LN_EPS) * gamma + beta


def _mxu(x, w):
    # bf16 operands, f32 accumulation on the MXU.
    return jnp.dot(x.astype(jnp.bfloat16), w.astype(jnp.bfloat16),
                   preferred_element_type=jnp.float32)


def _dot_nt(x, y):
    # x @ y.T with bf16 operands, f32 accumulation (no materialized transpose).
    return jax.lax.dot_general(
        x.astype(jnp.bfloat16), y.astype(jnp.bfloat16),
        dimension_numbers=(((1,), (1,)), ((), ())),
        preferred_element_type=jnp.float32)


def _softmax_last(s):
    s = s - jnp.max(s, axis=-1, keepdims=True)
    p = jnp.exp(s)
    return p * pl.reciprocal(jnp.sum(p, axis=-1, keepdims=True), approx=True)


# ----------------------------------------------------------------------------
# Shared pair-bias kernel:  bias[i, j, h] = LayerNorm(z[i, j, :]) @ w_b
# ----------------------------------------------------------------------------
def _pair_bias_kernel(z_ref, ln_g, ln_b, w_b, o_ref):
    ti, n, c_z = z_ref.shape
    zn = _layer_norm(z_ref[...], ln_g[...], ln_b[...]).reshape(ti * n, c_z)
    o_ref[...] = _mxu(zn, w_b[...]).reshape(ti, n, -1)


def _pair_bias(z, ln_g, ln_b, w_b):
    n, _, c_z = z.shape
    h = w_b.shape[1]
    ti = _row_tile(n)
    return pl.pallas_call(
        _pair_bias_kernel,
        out_shape=jax.ShapeDtypeStruct((n, n, h), jnp.float32),
        grid=(n // ti,),
        in_specs=[pl.BlockSpec((ti, n, c_z), lambda i: (i, 0, 0)),
                  _full_spec(ln_g), _full_spec(ln_b), _full_spec(w_b)],
        out_specs=pl.BlockSpec((ti, n, h), lambda i: (i, 0, 0)),
        compiler_params=_cparams(("parallel",)),
    )(z, ln_g, ln_b, w_b)


# ----------------------------------------------------------------------------
# Triangle multiplication (outgoing / incoming), AF3 Alg. 12 / 13
# ----------------------------------------------------------------------------
def _tri_proj_kernel(z_ref, ln_g, ln_b, w_ap, w_ag, w_bp, w_bg, w_g,
                     a_ref, b_ref, g_ref):
    ti, n, c_z = z_ref.shape
    zn = _layer_norm(z_ref[...], ln_g[...], ln_b[...]).reshape(ti * n, c_z)
    a = jax.nn.sigmoid(_mxu(zn, w_ag[...])) * _mxu(zn, w_ap[...])
    b = jax.nn.sigmoid(_mxu(zn, w_bg[...])) * _mxu(zn, w_bp[...])
    g = jax.nn.sigmoid(_mxu(zn, w_g[...]))
    a_ref[...] = a.reshape(ti, n, -1)
    b_ref[...] = b.reshape(ti, n, -1)
    g_ref[...] = g.reshape(ti, n, c_z)


def _tri_pair_product_kernel(a_ref, b_ref, o_ref):
    # a_ref (C, TI, N), b_ref (C, TJ, N) -> o (C, TI, TJ): channel-batched A @ B^T.
    o_ref[...] = jax.lax.dot_general(
        a_ref[...].astype(jnp.bfloat16), b_ref[...].astype(jnp.bfloat16),
        dimension_numbers=(((2,), (2,)), ((0,), (0,))),
        preferred_element_type=jnp.float32)


def _tri_out_kernel(z_ref, t_ref, g_ref, ln2_g, ln2_b, w_out, o_ref):
    ti, n, c_t = t_ref.shape
    c_z = z_ref.shape[-1]
    tn = _layer_norm(t_ref[...], ln2_g[...], ln2_b[...]).reshape(ti * n, c_t)
    upd = g_ref[...].reshape(ti * n, c_z) * _mxu(tn, w_out[...])
    o_ref[...] = z_ref[...] + upd.reshape(ti, n, c_z)


def _tri_proj(z, p):
    n, _, c_z = z.shape
    c_t = p['w_ap'].shape[1]
    ti = _row_tile(n)
    row = lambda c: pl.BlockSpec((ti, n, c), lambda i: (i, 0, 0))
    return pl.pallas_call(
        _tri_proj_kernel,
        out_shape=(jax.ShapeDtypeStruct((n, n, c_t), jnp.float32),
                   jax.ShapeDtypeStruct((n, n, c_t), jnp.float32),
                   jax.ShapeDtypeStruct((n, n, c_z), jnp.float32)),
        grid=(n // ti,),
        in_specs=[row(c_z),
                  _full_spec(p['ln_g']), _full_spec(p['ln_b']),
                  _full_spec(p['w_ap']), _full_spec(p['w_ag']),
                  _full_spec(p['w_bp']), _full_spec(p['w_bg']),
                  _full_spec(p['w_g'])],
        out_specs=(row(c_t), row(c_t), row(c_z)),
        compiler_params=_cparams(("parallel",)),
    )(z, p['ln_g'], p['ln_b'], p['w_ap'], p['w_ag'], p['w_bp'], p['w_bg'], p['w_g'])


def _tri_pair_product(a_cm, b_cm):
    c_t, n, _ = a_cm.shape
    ti = _row_tile(n)
    tj = _col_tile(n)
    return pl.pallas_call(
        _tri_pair_product_kernel,
        out_shape=jax.ShapeDtypeStruct((c_t, n, n), jnp.float32),
        grid=(n // ti, n // tj),
        in_specs=[pl.BlockSpec((c_t, ti, n), lambda i, j: (0, i, 0)),
                  pl.BlockSpec((c_t, tj, n), lambda i, j: (0, j, 0))],
        out_specs=pl.BlockSpec((c_t, ti, tj), lambda i, j: (0, i, j)),
        compiler_params=_cparams(("parallel", "parallel")),
        cost_estimate=pl.CostEstimate(flops=2 * c_t * n * n * n,
                                      transcendentals=0,
                                      bytes_accessed=12 * c_t * n * n),
    )(a_cm, b_cm)


def _tri_out_project(z, t, g, p):
    n, _, c_z = z.shape
    c_t = t.shape[-1]
    ti = _row_tile(n)
    row = lambda c: pl.BlockSpec((ti, n, c), lambda i: (i, 0, 0))
    return pl.pallas_call(
        _tri_out_kernel,
        out_shape=jax.ShapeDtypeStruct((n, n, c_z), jnp.float32),
        grid=(n // ti,),
        in_specs=[row(c_z), row(c_t), row(c_z),
                  _full_spec(p['ln2_g']), _full_spec(p['ln2_b']),
                  _full_spec(p['w_out'])],
        out_specs=row(c_z),
        compiler_params=_cparams(("parallel",)),
    )(z, t, g, p['ln2_g'], p['ln2_b'], p['w_out'])


def triangle_multiplication(z, p, outgoing):
    """Returns z + TriangleMultiplication(z) (residual fused into the last kernel)."""
    a, b, g = _tri_proj(z, p)
    # Channel-major relayout (XLA glue) so the pair product is a leading-batch
    # MXU batched matmul inside the kernel:
    #   outgoing: t[i,j,c] = sum_k a[i,k,c] b[j,k,c]
    #   incoming: t[i,j,c] = sum_k a[k,i,c] b[k,j,c]
    perm = (2, 0, 1) if outgoing else (2, 1, 0)
    t_cm = _tri_pair_product(jnp.transpose(a, perm), jnp.transpose(b, perm))
    t = jnp.transpose(t_cm, (1, 2, 0))                       # (N, N, C_t)
    return _tri_out_project(z, t, g, p)


# ----------------------------------------------------------------------------
# Triangle attention (starting / ending node), AF3 Alg. 14 / 15
# ----------------------------------------------------------------------------
def _tri_attn_kernel(z_ref, bias_ref, ln_g, ln_b, w_q, w_k, w_v, w_g, w_o, o_ref,
                     *, num_heads, head_dim):
    ti, n, c_z = z_ref.shape
    zn = _layer_norm(z_ref[...], ln_g[...], ln_b[...])
    zf = zn.reshape(ti * n, c_z)
    q = _mxu(zf, w_q[...])
    k = _mxu(zf, w_k[...])
    v = _mxu(zf, w_v[...])
    g = jax.nn.sigmoid(_mxu(zf, w_g[...]))
    scale = 1.0 / (head_dim ** 0.5)
    heads = []
    for h in range(num_heads):
        sl = slice(h * head_dim, (h + 1) * head_dim)
        qh = q[:, sl].reshape(ti, n, head_dim)
        kh = k[:, sl].reshape(ti, n, head_dim)
        vh = v[:, sl].reshape(ti, n, head_dim)
        s = jnp.einsum('ijc,ikc->ijk',
                       qh.astype(jnp.bfloat16), kh.astype(jnp.bfloat16),
                       preferred_element_type=jnp.float32) * scale
        s = s + bias_ref[h][None, :, :]                      # hoisted bias (N, N)
        pr = _softmax_last(s)
        oh = jnp.einsum('ijk,ikc->ijc',
                        pr.astype(jnp.bfloat16), vh.astype(jnp.bfloat16),
                        preferred_element_type=jnp.float32)
        heads.append(oh.reshape(ti * n, head_dim))
    o_cat = jnp.concatenate(heads, axis=-1) * g              # (ti*n, H*d)
    delta = _mxu(o_cat, w_o[...])                            # single output projection
    o_ref[...] = z_ref[...] + delta.reshape(ti, n, c_z)


def _tri_attn(z, bias_hm, p, num_heads, head_dim):
    n, _, c_z = z.shape
    ti = _row_tile(n)
    hd = num_heads * head_dim
    kernel = functools.partial(_tri_attn_kernel,
                               num_heads=num_heads, head_dim=head_dim)
    flops = 10 * n * n * c_z * hd + 4 * num_heads * head_dim * n * n * n
    return pl.pallas_call(
        kernel,
        out_shape=jax.ShapeDtypeStruct((n, n, c_z), jnp.float32),
        grid=(n // ti,),
        in_specs=[pl.BlockSpec((ti, n, c_z), lambda i: (i, 0, 0)),
                  _full_spec(bias_hm),
                  _full_spec(p['ln_g']), _full_spec(p['ln_b']),
                  _full_spec(p['w_q']), _full_spec(p['w_k']), _full_spec(p['w_v']),
                  _full_spec(p['w_g']), _full_spec(p['w_o'])],
        out_specs=pl.BlockSpec((ti, n, c_z), lambda i: (i, 0, 0)),
        compiler_params=_cparams(("parallel",)),
        cost_estimate=pl.CostEstimate(flops=flops,
                                      transcendentals=num_heads * n * n * n,
                                      bytes_accessed=4 * n * n * (2 * c_z + num_heads)),
    )(z, bias_hm, p['ln_g'], p['ln_b'], p['w_q'], p['w_k'], p['w_v'],
      p['w_g'], p['w_o'])


def triangle_attention(z, p, num_heads, head_dim, ending):
    """Returns z + TriangleAttention(z) (residual fused into the kernel)."""
    if ending:
        # Ending-node == starting-node on the transposed pair rep (XLA glue transposes).
        z = jnp.swapaxes(z, 0, 1)
    bias = _pair_bias(z, p['ln_g'], p['ln_b'], p['w_b'])      # (N, N, H) one MXU matmul
    bias_hm = jnp.transpose(bias, (2, 0, 1))                  # head-major (H, N, N)
    out = _tri_attn(z, bias_hm, p, num_heads, head_dim)
    if ending:
        out = jnp.swapaxes(out, 0, 1)
    return out


# ----------------------------------------------------------------------------
# Transition (SwiGLU), AF3 Alg. 11 — used for both pair and single reps
# ----------------------------------------------------------------------------
def _transition_kernel(x_ref, ln_g, ln_b, w1, w2, w3, o_ref):
    shape = x_ref.shape
    c = shape[-1]
    xn = _layer_norm(x_ref[...], ln_g[...], ln_b[...]).reshape(-1, c)
    h = jax.nn.silu(_mxu(xn, w1[...])) * _mxu(xn, w2[...])
    o_ref[...] = x_ref[...] + _mxu(h, w3[...]).reshape(shape)


def pair_transition(z, p):
    n, _, c_z = z.shape
    ti = _row_tile(n)
    row = pl.BlockSpec((ti, n, c_z), lambda i: (i, 0, 0))
    return pl.pallas_call(
        _transition_kernel,
        out_shape=jax.ShapeDtypeStruct((n, n, c_z), jnp.float32),
        grid=(n // ti,),
        in_specs=[row, _full_spec(p['ln_g']), _full_spec(p['ln_b']),
                  _full_spec(p['w1']), _full_spec(p['w2']), _full_spec(p['w3'])],
        out_specs=row,
        compiler_params=_cparams(("parallel",)),
    )(z, p['ln_g'], p['ln_b'], p['w1'], p['w2'], p['w3'])


def single_transition(x, p):
    n, c = x.shape
    full = pl.BlockSpec((n, c), lambda i: (0, 0))
    return pl.pallas_call(
        _transition_kernel,
        out_shape=jax.ShapeDtypeStruct((n, c), jnp.float32),
        grid=(1,),
        in_specs=[full, _full_spec(p['ln_g']), _full_spec(p['ln_b']),
                  _full_spec(p['w1']), _full_spec(p['w2']), _full_spec(p['w3'])],
        out_specs=full,
        compiler_params=_cparams(("arbitrary",)),
    )(x, p['ln_g'], p['ln_b'], p['w1'], p['w2'], p['w3'])


# ----------------------------------------------------------------------------
# AttentionPairBias on the single rep (s=None, beta=None), AF3 Alg. 24
# ----------------------------------------------------------------------------
def _apb_kernel(a_ref, bias_ref, ln_g, ln_b, w_q, b_q, w_k, w_v, w_g, w_o, o_ref,
                *, num_heads, head_dim):
    n, c_s = a_ref.shape
    an = _layer_norm(a_ref[...], ln_g[...], ln_b[...])
    q = _mxu(an, w_q[...]) + b_q[...]
    k = _mxu(an, w_k[...])
    v = _mxu(an, w_v[...])
    g = jax.nn.sigmoid(_mxu(an, w_g[...]))
    scale = 1.0 / (head_dim ** 0.5)
    heads = []
    for h in range(num_heads):
        sl = slice(h * head_dim, (h + 1) * head_dim)
        s = _dot_nt(q[:, sl], k[:, sl]) * scale + bias_ref[h]
        pr = _softmax_last(s)
        heads.append(jnp.dot(pr.astype(jnp.bfloat16),
                             v[:, sl].astype(jnp.bfloat16),
                             preferred_element_type=jnp.float32))
    o_cat = jnp.concatenate(heads, axis=-1) * g
    o_ref[...] = a_ref[...] + _mxu(o_cat, w_o[...])


def attention_pair_bias(a, z, p, num_heads, head_dim):
    """Returns a + AttentionPairBias(a, pair=z) (residual fused)."""
    n, c_s = a.shape
    bias = _pair_bias(z, p['ln_z_g'], p['ln_z_b'], p['w_b'])  # (N, N, H)
    bias_hm = jnp.transpose(bias, (2, 0, 1))                  # (H, N, N)
    kernel = functools.partial(_apb_kernel, num_heads=num_heads, head_dim=head_dim)
    full = pl.BlockSpec((n, c_s), lambda i: (0, 0))
    return pl.pallas_call(
        kernel,
        out_shape=jax.ShapeDtypeStruct((n, c_s), jnp.float32),
        grid=(1,),
        in_specs=[full, _full_spec(bias_hm),
                  _full_spec(p['ln_a_g']), _full_spec(p['ln_a_b']),
                  _full_spec(p['w_q']), _full_spec(p['b_q']),
                  _full_spec(p['w_k']), _full_spec(p['w_v']),
                  _full_spec(p['w_g']), _full_spec(p['w_o'])],
        out_specs=full,
        compiler_params=_cparams(("arbitrary",)),
        cost_estimate=pl.CostEstimate(flops=12 * n * c_s * c_s + 4 * n * n * c_s,
                                      transcendentals=num_heads * n * n,
                                      bytes_accessed=4 * (n * c_s * 2 + num_heads * n * n)),
    )(a, bias_hm, p['ln_a_g'], p['ln_a_b'], p['w_q'], p['b_q'], p['w_k'],
      p['w_v'], p['w_g'], p['w_o'])


# ----------------------------------------------------------------------------
# PairformerBlock forward (residual adds are fused inside each kernel)
# ----------------------------------------------------------------------------
def pairformer_block(single_rep, pair_rep, params, cfg):
    h_tri = cfg['num_tri_attn_heads']
    c_tri = cfg['num_tri_attn_channels']
    h_pair = cfg['num_pair_heads']
    c_head = cfg['single_embedding_size'] // h_pair

    # DropoutByDimension == identity at inference (eval mode), so it is omitted.
    pair_rep = triangle_multiplication(pair_rep, params['tri_out'], outgoing=True)
    pair_rep = triangle_multiplication(pair_rep, params['tri_in'], outgoing=False)
    pair_rep = triangle_attention(pair_rep, params['tri_att_start'], h_tri, c_tri, ending=False)
    pair_rep = triangle_attention(pair_rep, params['tri_att_end'], h_tri, c_tri, ending=True)
    pair_rep = pair_transition(pair_rep, params['pair_transition'])
    if single_rep is not None:
        single_rep = attention_pair_bias(single_rep, pair_rep,
                                         params['attn_pair_bias'], h_pair, c_head)
        single_rep = single_transition(single_rep, params['single_transition'])
    return single_rep, pair_rep


# ----------------------------------------------------------------------------
# Deterministic synthetic parameters
# ----------------------------------------------------------------------------
def _linear(key, fan_in, fan_out):
    return (jax.random.normal(key, (fan_in, fan_out), jnp.float32)
            / jnp.sqrt(jnp.float32(fan_in)))


def init_params(key, cfg):
    c_s = cfg['single_embedding_size']
    c_z = cfg['pair_embedding_size']
    c_u = cfg['num_tri_update_channels']
    h_t = cfg['num_tri_attn_heads']
    c_t = cfg['num_tri_attn_channels']
    h_p = cfg['num_pair_heads']
    m = cfg['transition_multiplier']
    keys = iter(jax.random.split(key, 64))

    def tri_mult():
        return dict(ln_g=jnp.ones((1, c_z)), ln_b=jnp.zeros((1, c_z)),
                    w_ap=_linear(next(keys), c_z, c_u), w_ag=_linear(next(keys), c_z, c_u),
                    w_bp=_linear(next(keys), c_z, c_u), w_bg=_linear(next(keys), c_z, c_u),
                    w_g=_linear(next(keys), c_z, c_z),
                    ln2_g=jnp.ones((1, c_u)), ln2_b=jnp.zeros((1, c_u)),
                    w_out=_linear(next(keys), c_u, c_z))

    def tri_attn():
        return dict(ln_g=jnp.ones((1, c_z)), ln_b=jnp.zeros((1, c_z)),
                    w_q=_linear(next(keys), c_z, h_t * c_t),
                    w_k=_linear(next(keys), c_z, h_t * c_t),
                    w_v=_linear(next(keys), c_z, h_t * c_t),
                    w_g=_linear(next(keys), c_z, h_t * c_t),
                    w_b=_linear(next(keys), c_z, h_t),
                    w_o=_linear(next(keys), h_t * c_t, c_z))

    def trans(c):
        return dict(ln_g=jnp.ones((1, c)), ln_b=jnp.zeros((1, c)),
                    w1=_linear(next(keys), c, m * c), w2=_linear(next(keys), c, m * c),
                    w3=_linear(next(keys), m * c, c))

    apb = dict(ln_a_g=jnp.ones((1, c_s)), ln_a_b=jnp.zeros((1, c_s)),
               w_q=_linear(next(keys), c_s, c_s), b_q=jnp.zeros((1, c_s)),
               w_k=_linear(next(keys), c_s, c_s), w_v=_linear(next(keys), c_s, c_s),
               w_g=_linear(next(keys), c_s, c_s),
               ln_z_g=jnp.ones((1, c_z)), ln_z_b=jnp.zeros((1, c_z)),
               w_b=_linear(next(keys), c_z, h_p),
               w_o=_linear(next(keys), c_s, c_s))

    return dict(tri_out=tri_mult(), tri_in=tri_mult(),
                tri_att_start=tri_attn(), tri_att_end=tri_attn(),
                pair_transition=trans(c_z), single_transition=trans(c_s),
                attn_pair_bias=apb)


if __name__ == "__main__":
    cfg = dict(single_embedding_size=32,
               pair_embedding_size=16,
               num_tri_update_channels=16,
               num_tri_attn_channels=8,
               num_tri_attn_heads=2,
               num_pair_heads=4,
               transition_multiplier=2)
    n_tokens = 8

    key = jax.random.PRNGKey(0)
    k_params, k_single, k_pair = jax.random.split(key, 3)
    params = init_params(k_params, cfg)
    single_rep = jax.random.normal(k_single, (n_tokens, cfg['single_embedding_size']), jnp.float32)
    pair_rep = jax.random.normal(k_pair, (n_tokens, n_tokens, cfg['pair_embedding_size']), jnp.float32)

    single_out, pair_out = pairformer_block(single_rep, pair_rep, params, cfg)
    jax.block_until_ready((single_out, pair_out))

    assert single_out.shape == single_rep.shape
    assert pair_out.shape == pair_rep.shape
    assert bool(jnp.all(jnp.isfinite(single_out))) and bool(jnp.all(jnp.isfinite(pair_out)))
    print("KERNEL_OK")
</pallas_src>

<mosaic_0001>
module attributes {stable_mosaic.version = 11 : i64} {
  func.func @_tri_proj_kernel(%arg0: i32, %arg1: memref<8x8x16xf32, #tpu.memory_space<vmem>>, %arg2: memref<1x16xf32, #tpu.memory_space<vmem>>, %arg3: memref<1x16xf32, #tpu.memory_space<vmem>>, %arg4: memref<16x16xf32, #tpu.memory_space<vmem>>, %arg5: memref<16x16xf32, #tpu.memory_space<vmem>>, %arg6: memref<16x16xf32, #tpu.memory_space<vmem>>, %arg7: memref<16x16xf32, #tpu.memory_space<vmem>>, %arg8: memref<16x16xf32, #tpu.memory_space<vmem>>, %arg9: memref<8x8x16xf32, #tpu.memory_space<vmem>>, %arg10: memref<8x8x16xf32, #tpu.memory_space<vmem>>, %arg11: memref<8x8x16xf32, #tpu.memory_space<vmem>>) attributes {dimension_semantics = [#tpu.dimension_semantics<parallel>], iteration_bounds = array<i64: 1>, scalar_prefetch = 0 : i64, scratch_operands = 0 : i64, tpu.core_type = #tpu.core_type<tc>, window_params = [{transform_indices = @transform_0, window_bounds = array<i64: 8, 8, 16>}, {pipeline_mode = #tpu.pipeline_mode<synchronous>, transform_indices = @transform_1, window_bounds = array<i64: 1, 16>}, {pipeline_mode = #tpu.pipeline_mode<synchronous>, transform_indices = @transform_2, window_bounds = array<i64: 1, 16>}, {pipeline_mode = #tpu.pipeline_mode<synchronous>, transform_indices = @transform_3, window_bounds = array<i64: 16, 16>}, {pipeline_mode = #tpu.pipeline_mode<synchronous>, transform_indices = @transform_4, window_bounds = array<i64: 16, 16>}, {pipeline_mode = #tpu.pipeline_mode<synchronous>, transform_indices = @transform_5, window_bounds = array<i64: 16, 16>}, {pipeline_mode = #tpu.pipeline_mode<synchronous>, transform_indices = @transform_6, window_bounds = array<i64: 16, 16>}, {pipeline_mode = #tpu.pipeline_mode<synchronous>, transform_indices = @transform_7, window_bounds = array<i64: 16, 16>}, {transform_indices = @transform_8, window_bounds = array<i64: 8, 8, 16>}, {transform_indices = @transform_9, window_bounds = array<i64: 8, 8, 16>}, {transform_indices = @transform_10, window_bounds = array<i64: 8, 8, 16>}]} {
    %c0 = arith.constant 0 : index
    %c0_0 = arith.constant 0 : index
    %c0_1 = arith.constant 0 : index
    %0 = vector.load %arg1[%c0, %c0_0, %c0_1] : memref<8x8x16xf32, #tpu.memory_space<vmem>>, vector<8x8x16xf32>
    %c0_2 = arith.constant 0 : index
    %c0_3 = arith.constant 0 : index
    %1 = vector.load %arg2[%c0_2, %c0_3] : memref<1x16xf32, #tpu.memory_space<vmem>>, vector<1x16xf32>
    %c0_4 = arith.constant 0 : index
    %c0_5 = arith.constant 0 : index
    %2 = vector.load %arg3[%c0_4, %c0_5] : memref<1x16xf32, #tpu.memory_space<vmem>>, vector<1x16xf32>
    %cst = arith.constant dense<0.000000e+00> : vector<8x8xf32>
    %3 = vector.multi_reduction <add>, %0, %cst [2] : vector<8x8x16xf32> to vector<8x8xf32>
    %4 = vector.shape_cast %3 : vector<8x8xf32> to vector<8x8x1xf32>
    %cst_6 = arith.constant 1.600000e+01 : f32
    %5 = vector.broadcast %cst_6 : f32 to vector<8x8x1xf32>
    %6 = arith.divf %4, %5 : vector<8x8x1xf32>
    %7 = vector.broadcast %6 : vector<8x8x1xf32> to vector<8x8x16xf32>
    %8 = arith.subf %0, %7 : vector<8x8x16xf32>
    %9 = arith.mulf %8, %8 : vector<8x8x16xf32>
    %cst_7 = arith.constant dense<0.000000e+00> : vector<8x8xf32>
    %10 = vector.multi_reduction <add>, %9, %cst_7 [2] : vector<8x8x16xf32> to vector<8x8xf32>
    %11 = vector.shape_cast %10 : vector<8x8xf32> to vector<8x8x1xf32>
    %cst_8 = arith.constant 1.600000e+01 : f32
    %12 = vector.broadcast %cst_8 : f32 to vector<8x8x1xf32>
    %13 = arith.divf %11, %12 : vector<8x8x1xf32>
    %14 = vector.broadcast %6 : vector<8x8x1xf32> to vector<8x8x16xf32>
    %15 = arith.subf %0, %14 : vector<8x8x16xf32>
    %cst_9 = arith.constant 9.99999974E-6 : f32
    %16 = vector.broadcast %cst_9 : f32 to vector<8x8x1xf32>
    %17 = arith.addf %13, %16 : vector<8x8x1xf32>
    %18 = math.rsqrt %17 : vector<8x8x1xf32>
    %19 = vector.broadcast %18 : vector<8x8x1xf32> to vector<8x8x16xf32>
    %20 = arith.mulf %15, %19 : vector<8x8x16xf32>
    %21 = vector.shape_cast %1 : vector<1x16xf32> to vector<1x1x16xf32>
    %22 = vector.broadcast %21 : vector<1x1x16xf32> to vector<8x8x16xf32>
    %23 = arith.mulf %20, %22 : vector<8x8x16xf32>
    %24 = vector.shape_cast %2 : vector<1x16xf32> to vector<1x1x16xf32>
    %25 = vector.broadcast %24 : vector<1x1x16xf32> to vector<8x8x16xf32>
    %26 = arith.addf %23, %25 : vector<8x8x16xf32>
    %27 = vector.shape_cast %26 : vector<8x8x16xf32> to vector<64x16xf32>
    %c0_10 = arith.constant 0 : index
    %c0_11 = arith.constant 0 : index
    %28 = vector.load %arg5[%c0_10, %c0_11] : memref<16x16xf32, #tpu.memory_space<vmem>>, vector<16x16xf32>
    %29 = arith.truncf %27 : vector<64x16xf32> to vector<64x16xbf16>
    %30 = arith.truncf %28 : vector<16x16xf32> to vector<16x16xbf16>
    %cst_12 = arith.constant dense<0.000000e+00> : vector<64x16xf32>
    %31 = tpu.matmul %29, %30, %cst_12 {dimension_numbers = #tpu.dot_dimension_numbers<[1], [0], [0], [1], [0, 0, 1, 1], [], []>} : vector<64x16xbf16>, vector<16x16xbf16>, vector<64x16xf32> -> vector<64x16xf32>
    %32 = arith.negf %31 : vector<64x16xf32>
    %33 = math.exp %32 : vector<64x16xf32>
    %cst_13 = arith.constant 1.000000e+00 : f32
    %34 = vector.broadcast %cst_13 : f32 to vector<64x16xf32>
    %35 = arith.addf %34, %33 : vector<64x16xf32>
    %36 = arith.divf %34, %35 : vector<64x16xf32>
    %c0_14 = arith.constant 0 : index
    %c0_15 = arith.constant 0 : index
    %37 = vector.load %arg4[%c0_14, %c0_15] : memref<16x16xf32, #tpu.memory_space<vmem>>, vector<16x16xf32>
    %38 = arith.truncf %27 : vector<64x16xf32> to vector<64x16xbf16>
    %39 = arith.truncf %37 : vector<16x16xf32> to vector<16x16xbf16>
    %cst_16 = arith.constant dense<0.000000e+00> : vector<64x16xf32>
    %40 = tpu.matmul %38, %39, %cst_16 {dimension_numbers = #tpu.dot_dimension_numbers<[1], [0], [0], [1], [0, 0, 1, 1], [], []>} : vector<64x16xbf16>, vector<16x16xbf16>, vector<64x16xf32> -> vector<64x16xf32>
    %41 = arith.mulf %36, %40 : vector<64x16xf32>
    %c0_17 = arith.constant 0 : index
    %c0_18 = arith.constant 0 : index
    %42 = vector.load %arg7[%c0_17, %c0_18] : memref<16x16xf32, #tpu.memory_space<vmem>>, vector<16x16xf32>
    %43 = arith.truncf %27 : vector<64x16xf32> to vector<64x16xbf16>
    %44 = arith.truncf %42 : vector<16x16xf32> to vector<16x16xbf16>
    %cst_19 = arith.constant dense<0.000000e+00> : vector<64x16xf32>
    %45 = tpu.matmul %43, %44, %cst_19 {dimension_numbers = #tpu.dot_dimension_numbers<[1], [0], [0], [1], [0, 0, 1, 1], [], []>} : vector<64x16xbf16>, vector<16x16xbf16>, vector<64x16xf32> -> vector<64x16xf32>
    %46 = arith.negf %45 : vector<64x16xf32>
    %47 = math.exp %46 : vector<64x16xf32>
    %cst_20 = arith.constant 1.000000e+00 : f32
    %48 = vector.broadcast %cst_20 : f32 to vector<64x16xf32>
    %49 = arith.addf %48, %47 : vector<64x16xf32>
    %50 = arith.divf %48, %49 : vector<64x16xf32>
    %c0_21 = arith.constant 0 : index
    %c0_22 = arith.constant 0 : index
    %51 = vector.load %arg6[%c0_21, %c0_22] : memref<16x16xf32, #tpu.memory_space<vmem>>, vector<16x16xf32>
    %52 = arith.truncf %27 : vector<64x16xf32> to vector<64x16xbf16>
    %53 = arith.truncf %51 : vector<16x16xf32> to vector<16x16xbf16>
    %cst_23 = arith.constant dense<0.000000e+00> : vector<64x16xf32>
    %54 = tpu.matmul %52, %53, %cst_23 {dimension_numbers = #tpu.dot_dimension_numbers<[1], [0], [0], [1], [0, 0, 1, 1], [], []>} : vector<64x16xbf16>, vector<16x16xbf16>, vector<64x16xf32> -> vector<64x16xf32>
    %55 = arith.mulf %50, %54 : vector<64x16xf32>
    %c0_24 = arith.constant 0 : index
    %c0_25 = arith.constant 0 : index
    %56 = vector.load %arg8[%c0_24, %c0_25] : memref<16x16xf32, #tpu.memory_space<vmem>>, vector<16x16xf32>
    %57 = arith.truncf %27 : vector<64x16xf32> to vector<64x16xbf16>
    %58 = arith.truncf %56 : vector<16x16xf32> to vector<16x16xbf16>
    %cst_26 = arith.constant dense<0.000000e+00> : vector<64x16xf32>
    %59 = tpu.matmul %57, %58, %cst_26 {dimension_numbers = #tpu.dot_dimension_numbers<[1], [0], [0], [1], [0, 0, 1, 1], [], []>} : vector<64x16xbf16>, vector<16x16xbf16>, vector<64x16xf32> -> vector<64x16xf32>
    %60 = arith.negf %59 : vector<64x16xf32>
    %61 = math.exp %60 : vector<64x16xf32>
    %cst_27 = arith.constant 1.000000e+00 : f32
    %62 = vector.broadcast %cst_27 : f32 to vector<64x16xf32>
    %63 = arith.addf %62, %61 : vector<64x16xf32>
    %64 = arith.divf %62, %63 : vector<64x16xf32>
    %65 = vector.shape_cast %41 : vector<64x16xf32> to vector<8x8x16xf32>
    %c0_28 = arith.constant 0 : index
    %c0_29 = arith.constant 0 : index
    %c0_30 = arith.constant 0 : index
    %66 = vector.load %arg9[%c0_28, %c0_29, %c0_30] : memref<8x8x16xf32, #tpu.memory_space<vmem>>, vector<8x8x16xf32>
    tpu.vector_store %arg9[%c0_28, %c0_29, %c0_30], %65 {strides = array<i32>} : memref<8x8x16xf32, #tpu.memory_space<vmem>>, vector<8x8x16xf32>,
    %67 = vector.shape_cast %55 : vector<64x16xf32> to vector<8x8x16xf32>
    %c0_31 = arith.constant 0 : index
    %c0_32 = arith.constant 0 : index
    %c0_33 = arith.constant 0 : index
    %68 = vector.load %arg10[%c0_31, %c0_32, %c0_33] : memref<8x8x16xf32, #tpu.memory_space<vmem>>, vector<8x8x16xf32>
    tpu.vector_store %arg10[%c0_31, %c0_32, %c0_33], %67 {strides = array<i32>} : memref<8x8x16xf32, #tpu.memory_space<vmem>>, vector<8x8x16xf32>,
    %69 = vector.shape_cast %64 : vector<64x16xf32> to vector<8x8x16xf32>
    %c0_34 = arith.constant 0 : index
    %c0_35 = arith.constant 0 : index
    %c0_36 = arith.constant 0 : index
    %70 = vector.load %arg11[%c0_34, %c0_35, %c0_36] : memref<8x8x16xf32, #tpu.memory_space<vmem>>, vector<8x8x16xf32>
    tpu.vector_store %arg11[%c0_34, %c0_35, %c0_36], %69 {strides = array<i32>} : memref<8x8x16xf32, #tpu.memory_space<vmem>>, vector<8x8x16xf32>,
    return
  }
  func.func @transform_0(%arg0: i32) -> (i32, i32, i32) {
    %c0_i32 = arith.constant 0 : i32
    %c0_i32_0 = arith.constant 0 : i32
    %c0_i32_1 = arith.constant 0 : i32
    return %arg0, %c0_i32, %c0_i32_0 : i32, i32, i32
  }
  func.func @transform_1(%arg0: i32) -> (i32, i32) {
    %c0_i32 = arith.constant 0 : i32
    %c0_i32_0 = arith.constant 0 : i32
    %c0_i32_1 = arith.constant 0 : i32
    return %c0_i32, %c0_i32_0 : i32, i32
  }
  func.func @transform_2(%arg0: i32) -> (i32, i32) {
    %c0_i32 = arith.constant 0 : i32
    %c0_i32_0 = arith.constant 0 : i32
    %c0_i32_1 = arith.constant 0 : i32
    return %c0_i32, %c0_i32_0 : i32, i32
  }
  func.func @transform_3(%arg0: i32) -> (i32, i32) {
    %c0_i32 = arith.constant 0 : i32
    %c0_i32_0 = arith.constant 0 : i32
    %c0_i32_1 = arith.constant 0 : i32
    return %c0_i32, %c0_i32_0 : i32, i32
  }
  func.func @transform_4(%arg0: i32) -> (i32, i32) {
    %c0_i32 = arith.constant 0 : i32
    %c0_i32_0 = arith.constant 0 : i32
    %c0_i32_1 = arith.constant 0 : i32
    return %c0_i32, %c0_i32_0 : i32, i32
  }
  func.func @transform_5(%arg0: i32) -> (i32, i32) {
    %c0_i32 = arith.constant 0 : i32
    %c0_i32_0 = arith.constant 0 : i32
    %c0_i32_1 = arith.constant 0 : i32
    return %c0_i32, %c0_i32_0 : i32, i32
  }
  func.func @transform_6(%arg0: i32) -> (i32, i32) {
    %c0_i32 = arith.constant 0 : i32
    %c0_i32_0 = arith.constant 0 : i32
    %c0_i32_1 = arith.constant 0 : i32
    return %c0_i32, %c0_i32_0 : i32, i32
  }
  func.func @transform_7(%arg0: i32) -> (i32, i32) {
    %c0_i32 = arith.constant 0 : i32
    %c0_i32_0 = arith.constant 0 : i32
    %c0_i32_1 = arith.constant 0 : i32
    return %c0_i32, %c0_i32_0 : i32, i32
  }
  func.func @transform_8(%arg0: i32) -> (i32, i32, i32) {
    %c0_i32 = arith.constant 0 : i32
    %c0_i32_0 = arith.constant 0 : i32
    %c0_i32_1 = arith.constant 0 : i32
    return %arg0, %c0_i32, %c0_i32_0 : i32, i32, i32
  }
  func.func @transform_9(%arg0: i32) -> (i32, i32, i32) {
    %c0_i32 = arith.constant 0 : i32
    %c0_i32_0 = arith.constant 0 : i32
    %c0_i32_1 = arith.constant 0 : i32
    return %arg0, %c0_i32, %c0_i32_0 : i32, i32, i32
  }
  func.func @transform_10(%arg0: i32) -> (i32, i32, i32) {
    %c0_i32 = arith.constant 0 : i32
    %c0_i32_0 = arith.constant 0 : i32
    %c0_i32_1 = arith.constant 0 : i32
    return %arg0, %c0_i32, %c0_i32_0 : i32, i32, i32
  }
}

</mosaic_0001>

<bundles_post_ra>
// kernel: tpu_custom_call.1
= control target key start
LH: loop header
LB: loop body
LE: loop exit
PB: predicated region body
PF: predicated region fallthrough
CT: control target
= control target key end

     0   :  { %16 = vsyncpa [#allocation3], 0  ;;  %s2275_s0 = inlined_call_operand.hbm [shape: f32[8,8,16], index: 0, kind: input, shape index: {}]   ;;  %s2276_s1 = inlined_call_operand.hbm [shape: f32[1,16], index: 1, kind: input, shape index: {}]   ;;  %s2277_s2 = inlined_call_operand.vmem [shape: f32[1,16], index: 2, kind: input, shape index: {}]   ;;  %s2278_s3 = inlined_call_operand.hbm [shape: f32[16,16], index: 3, kind: input, shape index: {}]   ;;  %s2279_s4 = inlined_call_operand.hbm [shape: f32[16,16], index: 4, kind: input, shape index: {}]   ;;  %s2280_s5 = inlined_call_operand.hbm [shape: f32[16,16], index: 5, kind: input, shape index: {}]   ;;  %s2281_s6 = inlined_call_operand.hbm [shape: f32[16,16], index: 6, kind: input, shape index: {}]   ;;  %s2282_s7 = inlined_call_operand.hbm [shape: f32[16,16], index: 7, kind: input, shape index: {}]   ;;  %s2283_s8 = inlined_call_operand.hbm [shape: f32[8,8,16], index: 8, kind: output, shape index: {0}]   ;;  %s2284_s9 = inlined_call_operand.hbm [shape: f32[8,8,16], index: 9, kind: output, shape index: {1}]   ;;  %s2285_s10 = inlined_call_operand.hbm [shape: f32[8,8,16], index: 10, kind: output, shape index: {2}]  }
   0x1   :  { %17 = vsyncpa [#allocation6], 0 }
   0x2   :  { %18 = vsyncpa [#allocation9], 0 }
   0x3   :  { %19 = vsyncpa [#allocation12], 0 }
   0x4   :  { %20 = vsyncpa [#allocation4], 0  ;;  %s40_s15 = sshll.u32 %s2276_s1, 4  ;;  %s41_s15 = int_to_ptr.hbm [resolvable:$true] %s40_s15 }
   0x5   :  { %21 = vsyncpa [#allocation16], 0  ;;  %s1515_s16 = smov [#allocation5]   ;;  %s65_s20 = sshll.u32 %s2279_s4, 4  ;;  %s66_s20 = int_to_ptr.hbm [resolvable:$true] %s65_s20 }
   0x6   :  { %s42_s17 = sshll.u32 %s1515_s16, 4  ;;  %s1516_s21 = smov [#allocation8]   ;;  %s43_s17 = int_to_ptr.vmem [resolvable:$true] %s42_s17 }
   0x7   :  { %45 = dma.hbm_to_vmem [thread:$0]  %s41_s15, 16, %s43_s17, [#allocation6]  }
   0x8   :  { %s67_s22 = sshll.u32 %s1516_s21, 4  ;;  %s91_s25 = sshll.u32 %s2281_s6, 4  ;;  %s68_s22 = int_to_ptr.vmem [resolvable:$true] %s67_s22  ;;  %s92_s25 = int_to_ptr.hbm [resolvable:$true] %s91_s25 }
   0x9   :  { %s1517_s1 = smov 128   ;;  %s1518_s26 = smov 8  }
   0xa   :  { %73 = dma.hbm_to_vmem [thread:$0]  %s66_s20, 256, %s68_s22, [#allocation9], %s1517_s1, %s1517_s1, %s1518_s26  }
   0xb   :  { %s26_s29 = sshll.u32 %s2275_s0, 4  ;;  %s1519_s4 = smov [#allocation11]   ;;  %s27_s29 = int_to_ptr.hbm [resolvable:$true] %s26_s29 }
   0xc   :  { %s93_s30 = sshll.u32 %s1519_s4, 4  ;;  %s1520_s6 = smov [#allocation2]   ;;  %s94_s30 = int_to_ptr.vmem [resolvable:$true] %s93_s30 }
   0xd   :  { %99 = dma.hbm_to_vmem [thread:$0]  %s92_s25, 256, %s94_s30, [#allocation12], %s1517_s1, %s1517_s1, %s1518_s26  }
   0xe   :  { %s28_s11 = sshll.u32 %s1520_s6, 4  ;;  %s52_s14 = sshll.u32 %s2278_s3, 4  ;;  %s29_s11 = int_to_ptr.vmem [resolvable:$true] %s28_s11  ;;  %s53_s14 = int_to_ptr.hbm [resolvable:$true] %s52_s14 }
   0xf   :  { %34 = dma.hbm_to_vmem [thread:$0]  %s27_s29, 1024, %s29_s11, [#allocation3], %s1517_s1, %s1517_s1, %s1518_s26  }
  0x10   :  { %s78_s16 = sshll.u32 %s2280_s5, 4  ;;  %s1521_s17 = smov [#allocation7]   ;;  %s79_s16 = int_to_ptr.hbm [resolvable:$true] %s78_s16 }
  0x11   :  { %s54_s18 = sshll.u32 %s1521_s17, 4  ;;  %s1522_s19 = smov [#allocation10]   ;;  %s55_s18 = int_to_ptr.vmem [resolvable:$true] %s54_s18 }
  0x12   :  { %60 = dma.hbm_to_vmem [thread:$0]  %s53_s14, 256, %s55_s18, [#allocation6], %s1517_s1, %s1517_s1, %s1518_s26  }
  0x13   :  { %s80_s3 = sshll.u32 %s1522_s19, 4  ;;  %s104_s22 = sshll.u32 %s2282_s7, 4  ;;  %s81_s3 = int_to_ptr.vmem [resolvable:$true] %s80_s3  ;;  %s105_s22 = int_to_ptr.hbm [resolvable:$true] %s104_s22 }
  0x14   :  { %86 = dma.hbm_to_vmem [thread:$0]  %s79_s16, 256, %s81_s3, [#allocation9], %s1517_s1, %s1517_s1, %s1518_s26  }
  0x15   :  { %s1523_s5 = smov [#allocation13]  }
  0x16   :  { %s106_s23 = sshll.u32 %s1523_s5, 4  ;;  %s107_s23 = int_to_ptr.vmem [resolvable:$true] %s106_s23 }
  0x17   :  { %112 = dma.hbm_to_vmem [thread:$0]  %s105_s22, 256, %s107_s23, [#allocation12], %s1517_s1, %s1517_s1, %s1518_s26  }
  0x18   :  { %1503 = dma.done.wait [#allocation3], 1024  }
  0x19   :  { %1504 = vsyncadd [#allocation3], 4294966272 }
  0x1a   :  { %1505 = dma.done.wait [#allocation6], 272  }
  0x1b   :  { %1506 = vsyncadd [#allocation6], 4294967024 }
  0x1c   :  { %1507 = dma.done.wait [#allocation9], 512  }
  0x1d   :  { %1508 = vsyncadd [#allocation9], 4294966784 }
  0x1e   :  { %1509 = dma.done.wait [#allocation12], 512  }
  0x1f   :  { %1510 = vsyncadd [#allocation12], 4294966784  ;;  %vm152_vm0 = vcmask 130048   ;;  %v148_v0 = vld [vmem:[#allocation2 + $0x30] sm:$0xff]  ;;  %v146_v1 = vld [vmem:[#allocation2 + $0x20] sm:$0xff]  ;;  %v1524_v16 = vmov 16.0  }
  0x20   :  { %v142_v2 = vld [vmem:[#allocation2] sm:$0xff]  ;;  %v171_v3 = vsel %vm152_vm0, %v148_v0, 0.0  ;;  %v165_v4 = vsel %vm152_vm0, %v146_v1, 0.0  ;;  %v149_v6 = vld [vmem:[#allocation2 + $0x38] sm:$0xff]  ;;  %v147_v7 = vld [vmem:[#allocation2 + $0x28] sm:$0xff]  ;;  %1149 = vrcp.f32 %v1524_v16  ;;  %s1036_s29 = sshll.u32 %s2283_s8, 4  ;;  %s1037_s29 = int_to_ptr.hbm [resolvable:$true] %s1036_s29 }
  0x21   :  { %v153_v5 = vsel %vm152_vm0, %v142_v2, 0.0  ;;  %172 = vadd.xlane.f32.xlu2 %v171_v3  ;;  %166 = vadd.xlane.f32.xlu0 %v165_v4  ;;  %v143_v8 = vld [vmem:[#allocation2 + $0x8] sm:$0xff]  ;;  %v174_v9 = vsel %vm152_vm0, %v149_v6, 0.0  ;;  %v168_v10 = vsel %vm152_vm0, %v147_v7, 0.0  ;;  %v144_v12 = vld [vmem:[#allocation2 + $0x10] sm:$0xff]  ;;  %v145_v13 = vld [vmem:[#allocation2 + $0x18] sm:$0xff] }
  0x22   :  { %154 = vadd.xlane.f32.xlu1 %v153_v5  ;;  %v156_v11 = vsel %vm152_vm0, %v143_v8, 0.0  ;;  %v159_v14 = vsel %vm152_vm0, %v144_v12, 0.0  ;;  %v162_v15 = vsel %vm152_vm0, %v145_v13, 0.0  ;;  %v358_v5 = vld [vmem:[#allocation8] sm:$0xff]  ;;  %s1526_s8 = smov [#allocation15]   ;;  %s1049_s11 = sshll.u32 %s2284_s9, 4  ;;  %s1050_s11 = int_to_ptr.hbm [resolvable:$true] %s1049_s11 }
  0x23   :  { %s1047_s4 = sshll.u32 %s1526_s8, 4  ;;  %s1527_s12 = smov [#allocation17]   ;;  %s1048_s4 = int_to_ptr.vmem [resolvable:$true] %s1047_s4 }
  0x24   :  { %s1060_s13 = sshll.u32 %s1527_s12, 4  ;;  %s1062_s15 = sshll.u32 %s2285_s10, 4  ;;  %s1061_s13 = int_to_ptr.vmem [resolvable:$true] %s1060_s13  ;;  %s1063_s15 = int_to_ptr.hbm [resolvable:$true] %s1062_s15 }
  0x26   :  { %v1150_v17 = vpop.eup %1149 }
  0x27   :  { %v178_v18 = vmul.f32 16.0, %v1150_v17  ;;  %vm182_vm1 = vweird.f32 %v1150_v17 }
  0x29   :  { %175 = vadd.xlane.f32.xlu2 %v174_v9  ;;  %169 = vadd.xlane.f32.xlu0 %v168_v10  ;;  %v179_v19 = vsub.f32 1.0, %v178_v18 }
  0x2a   :  { %157 = vadd.xlane.f32.xlu1 %v156_v11 }
  0x2b   :  { %v180_v20 = vmul.f32 %v1150_v17, %v179_v19 }
  0x2d   :  { %v181_v21 = vadd.f32 %v1150_v17, %v180_v20 }
  0x2f   :  { %v1630_v22 = vsel %vm182_vm1, %v1150_v17, %v181_v21 }
  0x31   :  { %160 = vadd.xlane.f32.xlu0 %v159_v14 }
  0x32   :  { %163 = vadd.xlane.f32.xlu1 %v162_v15 }
  0x94   :  { %v173_v23 = vpop.xlane.xlu2 %172  ;;  %v167_v24 = vpop.xlane.xlu0 %166 }
  0x95   :  { %v188_v25 = vmul.f32 %v1630_v22, %v167_v24  ;;  %v155_v26 = vpop.xlane.xlu1 %154  ;;  %v190_v36 = vmul.f32 %v1630_v22, %v173_v23 }
  0x96   :  { %v184_v27 = vmul.f32 %v1630_v22, %v155_v26 }
  0x97   :  { %v1634_v28 = vsub.f32 %v146_v1, %v188_v25  ;;  %v1654_v44 = vsub.f32 %v148_v0, %v190_v36 }
  0x98   :  { %v1636_v29 = vsub.f32 %v142_v2, %v184_v27 }
  0x99   :  { %v204_v30 = vmul.f32 %v1634_v28, %v1634_v28  ;;  %v206_v53 = vmul.f32 %v1654_v44, %v1654_v44 }
  0x9a   :  { %v200_v31 = vmul.f32 %v1636_v29, %v1636_v29 }
  0x9b   :  { %v220_v32 = vsel %vm152_vm0, %v204_v30, 0.0  ;;  %v226_v57 = vsel %vm152_vm0, %v206_v53, 0.0  ;;  %v598_v53 = vld [vmem:[#allocation11] sm:$0xff] }
  0x9c   :  { %v176_v33 = vpop.xlane.xlu2 %175  ;;  %221 = vadd.xlane.f32.xlu2 %v220_v32  ;;  %v170_v34 = vpop.xlane.xlu0 %169  ;;  %v208_v35 = vsel %vm152_vm0, %v200_v31, 0.0 }
  0x9d   :  { %v191_v37 = vmul.f32 %v1630_v22, %v176_v33  ;;  %v189_v38 = vmul.f32 %v1630_v22, %v170_v34  ;;  %209 = vadd.xlane.f32.xlu1 %v208_v35  ;;  %v158_v39 = vpop.xlane.xlu1 %157 }
  0x9e   :  { %v185_v40 = vmul.f32 %v1630_v22, %v158_v39 }
  0x9f   :  { %v1648_v41 = vsub.f32 %v149_v6, %v191_v37  ;;  %v1650_v42 = vsub.f32 %v147_v7, %v189_v38  ;;  %v359_v6 = vld [vmem:[#allocation8 + $0x8] sm:$0xff] }
  0xa0   :  { %v1652_v43 = vsub.f32 %v143_v8, %v185_v40  ;;  %v364_v7 = vpack.c.bf16 %v359_v6, %v358_v5 }
  0xa1   :  { %v205_v45 = vmul.f32 %v1650_v42, %v1650_v42  ;;  %v207_v46 = vmul.f32 %v1648_v41, %v1648_v41 }
  0xa2   :  { %v201_v47 = vmul.f32 %v1652_v43, %v1652_v43  ;;  %384 = vmatpush.bf16.msra.mxu0 %v364_v7  ;;  %1132 = vmatpush.bf16.msra.mxu2 %v364_v7 }
  0xa3   :  { %v223_v48 = vsel %vm152_vm0, %v205_v45, 0.0  ;;  %v229_v49 = vsel %vm152_vm0, %v207_v46, 0.0  ;;  %1133 = vmatpush.bf16.msra.mxu3 %v364_v7  ;;  %1131 = vmatpush.bf16.msra.mxu1 %v364_v7 }
  0xa4   :  { %224 = vadd.xlane.f32.xlu0 %v223_v48  ;;  %v161_v50 = vpop.xlane.xlu0 %160  ;;  %v211_v51 = vsel %vm152_vm0, %v201_v47, 0.0 }
  0xa5   :  { %v186_v52 = vmul.f32 %v1630_v22, %v161_v50  ;;  %230 = vadd.xlane.f32.xlu1 %v229_v49  ;;  %212 = vadd.xlane.f32.xlu2 %v211_v51  ;;  %v164_v54 = vpop.xlane.xlu1 %163 }
  0xa6   :  { %v187_v55 = vmul.f32 %v1630_v22, %v164_v54  ;;  %v599_v54 = vld [vmem:[#allocation11 + $0x8] sm:$0xff] }
  0xa7   :  { %v1669_v56 = vsub.f32 %v144_v12, %v186_v52  ;;  %v600_v5 = vpack.c.bf16 %v599_v54, %v598_v53 }
  0xa8   :  { %v1674_v59 = vsub.f32 %v145_v13, %v187_v55 }
  0xa9   :  { %v202_v58 = vmul.f32 %v1669_v56, %v1669_v56  ;;  %608 = vmatpush.bf16.msrb.mxu2 %v600_v5 }
  0xaa   :  { %v203_v61 = vmul.f32 %v1674_v59, %v1674_v59 }
  0xab   :  { %v214_v60 = vsel %vm152_vm0, %v202_v58, 0.0 }
  0xac   :  { %227 = vadd.xlane.f32.xlu0 %v226_v57  ;;  %v217_v62 = vsel %vm152_vm0, %v203_v61, 0.0  ;;  %v822_v61 = vld [vmem:[#allocation13] sm:$0xff] }
  0xad   :  { %215 = vadd.xlane.f32.xlu2 %v214_v60 }
  0xb4   :  { %218 = vadd.xlane.f32.xlu0 %v217_v62  ;;  %v823_v62 = vld [vmem:[#allocation13 + $0x8] sm:$0xff] }
 0x10f   :  { %v222_v63 = vpop.xlane.xlu2 %221 }
 0x110   :  { %v236_v0 = vmul.f32 %v222_v63, %v1630_v22  ;;  %v210_v1 = vpop.xlane.xlu1 %209  ;;  %v1734_v63 = vld [vmem:[#allocation5] ss:$0 sm:$0xff] }
 0x111   :  { %v232_v2 = vmul.f32 %v210_v1, %v1630_v22 }
 0x112   :  { %v244_v3 = vadd.f32 1e-05, %v236_v0 }
 0x113   :  { %v240_v4 = vadd.f32 1e-05, %v232_v2 }
 0x114   :  { %1151 = vrsqrt.f32 %v244_v3  ;;  %vm294_vm3 = vweird.f32 %v244_v3 }
 0x115   :  { %1153 = vrsqrt.f32 %v240_v4  ;;  %vm254_vm4 = vweird.f32 %v240_v4 }
 0x117   :  { %v225_v8 = vpop.xlane.xlu0 %224 }
 0x118   :  { %v237_v9 = vmul.f32 %v225_v8, %v1630_v22  ;;  %v213_v10 = vpop.xlane.xlu2 %212  ;;  %v231_v11 = vpop.xlane.xlu1 %230 }
 0x119   :  { %v233_v12 = vmul.f32 %v213_v10, %v1630_v22  ;;  %v239_v13 = vmul.f32 %v231_v11, %v1630_v22  ;;  %v824_v10 = vpack.c.bf16 %v823_v62, %v822_v61  ;;  %v782_v11 = vld [vmem:[#allocation10] sm:$0xff] }
 0x11a   :  { %v1152_v14 = vpop.eup %1151  ;;  %v1685_v15 = vadd.f32 1e-05, %v237_v9 }
 0x11b   :  { %v1154_v16 = vpop.eup %1153  ;;  %v289_v17 = vmul.f32 %v1152_v14, %v244_v3  ;;  %v1687_v18 = vadd.f32 1e-05, %v233_v12  ;;  %v1689_v19 = vadd.f32 1e-05, %v239_v13  ;;  %vm295_vm2 = vweird.f32 %v1152_v14  ;;  %v783_v12 = vld [vmem:[#allocation10 + $0x8] sm:$0xff]  ;;  %832 = vmatpush.bf16.msrb.mxu0 %v824_v10 }
 0x11c   :  { %v249_v20 = vmul.f32 %v1154_v16, %v240_v4  ;;  %1155 = vrsqrt.f32 %v1685_v15  ;;  %vm255_vm5 = vweird.f32 %v1154_v16  ;;  %vm1708_vm6 = vmor %vm294_vm3, %vm295_vm2  ;;  %vm304_vm7 = vweird.f32 %v1685_v15 }
 0x11d   :  { %v290_v21 = vmul.f32 %v1152_v14, %v289_v17  ;;  %1157 = vrsqrt.f32 %v1687_v18  ;;  %vm1722_vm8 = vmor %vm254_vm4, %vm255_vm5  ;;  %vm264_vm10 = vweird.f32 %v1687_v18  ;;  %vm324_vm11 = vweird.f32 %v1689_v19 }
 0x11e   :  { %v250_v23 = vmul.f32 %v1154_v16, %v249_v20  ;;  %1159 = vrsqrt.f32 %v1689_v19  ;;  %v1767_v20 = vld [vmem:[%s2277_s2] ss:$0 sm:$0xff]  ;;  %s1525_s2 = smov [#allocation14]  }
 0x11f   :  { %v291_v24 = vmul.f32 0.5, %v290_v21  ;;  %v228_v25 = vpop.xlane.xlu0 %227  ;;  %s2245_s25 = sshll.u32 %s1525_s2, 4  ;;  %s1035_s25 = int_to_ptr.vmem [resolvable:$true] %s2245_s25 }
 0x120   :  { %v251_v26 = vmul.f32 0.5, %v250_v23  ;;  %v238_v27 = vmul.f32 %v228_v25, %v1630_v22  ;;  %v216_v30 = vpop.xlane.xlu2 %215 }
 0x121   :  { %v292_v31 = vsub.f32 1.5, %v291_v24  ;;  %v234_v32 = vmul.f32 %v216_v30, %v1630_v22  ;;  %v784_v24 = vpack.c.bf16 %v783_v12, %v782_v11 }
 0x122   :  { %v1696_v33 = vpop.eup %1155  ;;  %v252_v34 = vsub.f32 1.5, %v251_v26  ;;  %v1698_v35 = vadd.f32 1e-05, %v238_v27 }
 0x123   :  { %v1700_v36 = vpop.eup %1157  ;;  %v293_v37 = vmul.f32 %v1152_v14, %v292_v31  ;;  %v299_v38 = vmul.f32 %v1696_v33, %v1685_v15  ;;  %v1704_v39 = vadd.f32 1e-05, %v234_v32  ;;  %vm305_vm9 = vweird.f32 %v1696_v33  ;;  %v558_v31 = vld [vmem:[#allocation7] sm:$0xff]  ;;  %v559_v32 = vld [vmem:[#allocation7 + $0x8] sm:$0xff]  ;;  %792 = vmatpush.bf16.msrb.mxu3 %v784_v24 }
 0x124   :  { %v1706_v40 = vpop.eup %1159  ;;  %v253_v46 = vmul.f32 %v1154_v16, %v252_v34  ;;  %v259_v47 = vmul.f32 %v1700_v36, %v1687_v18  ;;  %1161 = vrsqrt.f32 %v1698_v35  ;;  %vm265_vm12 = vweird.f32 %v1700_v36  ;;  %vm1748_vm14 = vmor %vm304_vm7, %vm305_vm9 }
 0x125   :  { %v297_v48 = vsel %vm1708_vm6, %v1152_v14, %v293_v37  ;;  %v300_v49 = vmul.f32 %v1696_v33, %v299_v38  ;;  %v319_v50 = vmul.f32 %v1706_v40, %v1689_v19  ;;  %1163 = vrsqrt.f32 %v1704_v39  ;;  %vm266_vm1 = vmor %vm264_vm10, %vm265_vm12 }
 0x126   :  { %v260_v52 = vmul.f32 %v1700_v36, %v259_v47  ;;  %v257_v55 = vsel %vm1722_vm8, %v1154_v16, %v253_v46  ;;  %v332_v0 = vmul.f32 %v297_v48, %v1634_v28  ;;  %vm325_vm13 = vweird.f32 %v1706_v40 }
 0x127   :  { %v301_v57 = vmul.f32 0.5, %v300_v49  ;;  %v320_v58 = vmul.f32 %v1706_v40, %v319_v50  ;;  %v219_v60 = vpop.xlane.xlu0 %218  ;;  %v328_v7 = vmul.f32 %v257_v55, %v1636_v29  ;;  %vm1759_vm15 = vmor %vm324_vm11, %vm325_vm13  ;;  %v560_v37 = vpack.c.bf16 %v559_v32, %v558_v31 }
 0x128   :  { %v261_v1 = vmul.f32 0.5, %v260_v52  ;;  %v235_v2 = vmul.f32 %v219_v60, %v1630_v22  ;;  %v343_v29 = vmul.f32 %v1734_v63, %v332_v0  ;;  %vm314_vm2 = vweird.f32 %v1698_v35 }
 0x129   :  { %v302_v3 = vsub.f32 1.5, %v301_v57  ;;  %v321_v4 = vmul.f32 0.5, %v320_v58  ;;  %v339_v25 = vmul.f32 %v1734_v63, %v328_v7  ;;  %vm274_vm3 = vweird.f32 %v1704_v39  ;;  %568 = vmatpush.bf16.msrb.mxu1 %v560_v37 }
 0x12a   :  { %v1162_v6 = vpop.eup %1161  ;;  %v262_v8 = vsub.f32 1.5, %v261_v1  ;;  %v1741_v9 = vadd.f32 1e-05, %v235_v2 }
 0x12b   :  { %v303_v28 = vmul.f32 %v1696_v33, %v302_v3  ;;  %v322_v13 = vsub.f32 1.5, %v321_v4  ;;  %v309_v14 = vmul.f32 %v1162_v6, %v1698_v35  ;;  %v1164_v15 = vpop.eup %1163  ;;  %vm315_vm4 = vweird.f32 %v1162_v6 }
 0x12c   :  { %v263_v16 = vmul.f32 %v1700_v36, %v262_v8  ;;  %1165 = vrsqrt.f32 %v1741_v9  ;;  %v269_v30 = vmul.f32 %v1164_v15, %v1704_v39  ;;  %vm275_vm5 = vweird.f32 %v1164_v15  ;;  %vm316_vm6 = vmor %vm314_vm2, %vm315_vm4 }
 0x12d   :  { %v307_v21 = vsel %vm1748_vm14, %v1696_v33, %v303_v28  ;;  %v323_v19 = vmul.f32 %v1706_v40, %v322_v13  ;;  %v310_v23 = vmul.f32 %v1162_v6, %v309_v14  ;;  %v350_v49 = vadd.f32 %v1767_v20, %v339_v25  ;;  %vm1799_vm7 = vmor %vm274_vm3, %vm275_vm5 }
 0x12e   :  { %v333_v26 = vmul.f32 %v307_v21, %v1650_v42  ;;  %v267_v27 = vsel %vm266_vm1, %v1700_v36, %v263_v16  ;;  %v270_v42 = vmul.f32 %v1164_v15, %v269_v30  ;;  %v354_v36 = vadd.f32 %v1767_v20, %v343_v29 }
 0x12f   :  { %v329_v33 = vmul.f32 %v267_v27, %v1652_v43  ;;  %v327_v18 = vsel %vm1759_vm15, %v1706_v40, %v323_v19  ;;  %v311_v34 = vmul.f32 0.5, %v310_v23  ;;  %vm284_vm8 = vweird.f32 %v1741_v9 }
 0x130   :  { %v344_v38 = vmul.f32 %v1734_v63, %v333_v26  ;;  %v335_v47 = vmul.f32 %v327_v18, %v1648_v41  ;;  %v271_v48 = vmul.f32 0.5, %v270_v42 }
 0x131   :  { %v340_v45 = vmul.f32 %v1734_v63, %v329_v33  ;;  %v312_v46 = vsub.f32 1.5, %v311_v34 }
 0x132   :  { %v1166_v43 = vpop.eup %1165  ;;  %v355_v40 = vadd.f32 %v1767_v20, %v344_v38  ;;  %v272_v53 = vsub.f32 1.5, %v271_v48  ;;  %v346_v60 = vmul.f32 %v1734_v63, %v335_v47 }
 0x133   :  { %v351_v50 = vadd.f32 %v1767_v20, %v340_v45  ;;  %v313_v51 = vmul.f32 %v1162_v6, %v312_v46  ;;  %v279_v52 = vmul.f32 %v1166_v43, %v1741_v9  ;;  %vm285_vm9 = vweird.f32 %v1166_v43 }
 0x134   :  { %v362_v54 = vpack.c.bf16 %v355_v40, %v354_v36  ;;  %v273_v62 = vmul.f32 %v1164_v15, %v272_v53  ;;  %v357_v2 = vadd.f32 %v1767_v20, %v346_v60  ;;  %vm286_vm10 = vmor %vm284_vm8, %vm285_vm9 }
 0x135   :  { %v317_v55 = vsel %vm316_vm6, %v1162_v6, %v313_v51  ;;  %v280_v41 = vmul.f32 %v1166_v43, %v279_v52  ;;  %v360_v58 = vpack.c.bf16 %v351_v50, %v350_v49 }
 0x136   :  { %v334_v61 = vmul.f32 %v317_v55, %v1654_v44  ;;  %1089 = vmatmul.msk.bf16.vlgmr.msra.gmra.mxu2 %vm152_vm0, %v362_v54  ;;  %v277_v0 = vsel %vm1799_vm7, %v1164_v15, %v273_v62 }
 0x137   :  { %v281_v35 = vmul.f32 0.5, %v280_v41  ;;  %1087 = vmatmul.msk.bf16.vlgmr.msra.gmra.mxu0 %vm152_vm0, %v360_v58  ;;  %v330_v44 = vmul.f32 %v277_v0, %v1669_v56 }
 0x138   :  { %v345_v39 = vmul.f32 %v1734_v63, %v334_v61 }
 0x139   :  { %v282_v1 = vsub.f32 1.5, %v281_v35  ;;  %v341_v7 = vmul.f32 %v1734_v63, %v330_v44 }
 0x13a   :  { %v356_v3 = vadd.f32 %v1767_v20, %v345_v39 }
 0x13b   :  { %v283_v4 = vmul.f32 %v1166_v43, %v282_v1  ;;  %v352_v10 = vadd.f32 %v1767_v20, %v341_v7 }
 0x13c   :  { %v363_v5 = vpack.c.bf16 %v357_v2, %v356_v3 }
 0x13d   :  { %v287_v6 = vsel %vm286_vm10, %v1166_v43, %v283_v4 }
 0x13e   :  { %v331_v8 = vmul.f32 %v287_v6, %v1674_v59  ;;  %1090 = vmatmul.msk.bf16.vlgmr.msra.gmra.mxu3 %vm152_vm0, %v363_v5 }
 0x140   :  { %v342_v9 = vmul.f32 %v1734_v63, %v331_v8 }
 0x142   :  { %v353_v11 = vadd.f32 %v1767_v20, %v342_v9 }
 0x144   :  { %v361_v12 = vpack.c.bf16 %v353_v11, %v352_v10 }
 0x146   :  { %1088 = vmatmul.msk.bf16.vlgmr.msra.gmra.mxu1 %vm152_vm0, %v361_v12  ;;  %1103 = vmatmul.msk.bf16.vlgmr.msrb.gmra.mxu2 %vm152_vm0, %v360_v58 }
 0x147   :  { %1119 = vmatmul.msk.bf16.vlgmr.msrb.gmra.mxu0 %vm152_vm0, %v360_v58 }
 0x14e   :  { %1115 = vmatmul.msk.bf16.vlgmr.msrb.gmra.mxu3 %vm152_vm0, %v360_v58 }
 0x156   :  { %1099 = vmatmul.msk.bf16.vlgmr.msrb.gmra.mxu1 %vm152_vm0, %v360_v58  ;;  %1104 = vmatmul.msk.bf16.gmra.mxu2 %vm152_vm0, %v361_v12 }
 0x157   :  { %1120 = vmatmul.msk.bf16.gmra.mxu0 %vm152_vm0, %v361_v12 }
 0x15e   :  { %1116 = vmatmul.msk.bf16.gmra.mxu3 %vm152_vm0, %v361_v12 }
 0x166   :  { %1100 = vmatmul.msk.bf16.gmra.mxu1 %vm152_vm0, %v361_v12  ;;  %1105 = vmatmul.msk.bf16.gmra.mxu2 %vm152_vm0, %v362_v54 }
 0x167   :  { %1121 = vmatmul.msk.bf16.gmra.mxu0 %vm152_vm0, %v362_v54 }
 0x16e   :  { %1117 = vmatmul.msk.bf16.gmra.mxu3 %vm152_vm0, %v362_v54 }
 0x176   :  { %1101 = vmatmul.msk.bf16.gmra.mxu1 %vm152_vm0, %v362_v54  ;;  %1106 = vmatmul.msk.bf16.gmra.mxu2 %vm152_vm0, %v363_v5 }
 0x177   :  { %1122 = vmatmul.msk.bf16.gmra.mxu0 %vm152_vm0, %v363_v5 }
 0x17e   :  { %1118 = vmatmul.msk.bf16.gmra.mxu3 %vm152_vm0, %v363_v5 }
 0x186   :  { %1102 = vmatmul.msk.bf16.gmra.mxu1 %vm152_vm0, %v363_v5 }
 0x1b4   :  { %v386_v56 = vpop.f32.mrf.mxu0 }
 0x1b5   :  { %v1091_v59 = vmul.f32 -1.442695, %v386_v56 }
 0x1b7   :  { %1167 = vpow2.f32 %v1091_v59 }
 0x1b9   :  { %v396_v63 = vpop.f32.mrf.mxu2 }
 0x1ba   :  { %v1095_v28 = vmul.f32 -1.442695, %v396_v63 }
 0x1bc   :  { %v388_v22 = vpop.f32.mrf.mxu0  ;;  %1169 = vpow2.f32 %v1095_v28 }
 0x1bd   :  { %v1168_v13 = vpop.eup %1167  ;;  %v1092_v14 = vmul.f32 -1.442695, %v388_v22 }
 0x1be   :  { %v430_v29 = vadd.f32 1.0, %v1168_v13 }
 0x1bf   :  { %1171 = vpow2.f32 %v1092_v14 }
 0x1c0   :  { %1173 = vrcp.f32 %v430_v29  ;;  %v449_v50 = vand.u32 2147483648, %v430_v29  ;;  %vm443_vm12 = vweird.f32 %v430_v29  ;;  %v447_v53 = vand.u32 2147483647, %v430_v29 }
 0x1c1   :  { %v398_v16 = vpop.f32.mrf.mxu2  ;;  %v401_v17 = vpop.f32.mrf.mxu3 }
 0x1c2   :  { %v1096_v15 = vmul.f32 -1.442695, %v398_v16  ;;  %v1097_v20 = vmul.f32 -1.442695, %v401_v17  ;;  %v1170_v19 = vpop.eup %1169  ;;  %v450_v35 = vor.u32 1.1754944e-38, %v449_v50  ;;  %vm448_vm14 = vcmp.eq.f32.partialorder %v447_v53, 8.507059e+37 }
 0x1c3   :  { %v391_v21 = vpop.f32.mrf.mxu1  ;;  %v1839_v32 = vadd.f32 1.0, %v1170_v19 }
 0x1c4   :  { %1175 = vpow2.f32 %v1096_v15  ;;  %v1093_v23 = vmul.f32 -1.442695, %v391_v21  ;;  %v834_v24 = vpop.f32.mrf.mxu0 }
 0x1c5   :  { %v1172_v25 = vpop.eup %1171  ;;  %v1123_v26 = vmul.f32 -1.442695, %v834_v24  ;;  %1177 = vpow2.f32 %v1097_v20 }
 0x1c6   :  { %v1174_v27 = vpop.eup %1173  ;;  %v1837_v30 = vadd.f32 1.0, %v1172_v25  ;;  %1179 = vpow2.f32 %v1093_v23 }
 0x1c7   :  { %v439_v31 = vmul.f32 %v1174_v27, %v430_v29  ;;  %vm444_vm11 = vweird.f32 %v1174_v27 }
 0x1c8   :  { %1181 = vrcp.f32 %v1837_v30  ;;  %vm1850_vm13 = vmor %vm443_vm12, %vm444_vm11  ;;  %v462_v1 = vand.u32 2147483647, %v1837_v30  ;;  %v464_v2 = vand.u32 2147483648, %v1837_v30  ;;  %vm458_vm1 = vweird.f32 %v1837_v30 }
 0x1c9   :  { %1183 = vpow2.f32 %v1123_v26  ;;  %v403_v33 = vpop.f32.mrf.mxu3  ;;  %v610_v18 = vpop.f32.mrf.mxu2  ;;  %v440_v34 = vsub.f32 1.0, %v439_v31 }
 0x1ca   :  { %v1176_v37 = vpop.eup %1175  ;;  %v1098_v38 = vmul.f32 -1.442695, %v403_v33  ;;  %v1107_v42 = vmul.f32 -1.442695, %v610_v18  ;;  %1185 = vrcp.f32 %v1839_v32  ;;  %vm1886_vm2 = vcmp.eq.f32.partialorder %v462_v1, 8.507059e+37 }
 0x1cb   :  { %v1842_v36 = vadd.f32 1.0, %v1176_v37  ;;  %v393_v45 = vpop.f32.mrf.mxu1  ;;  %v441_v46 = vmul.f32 %v1174_v27, %v440_v34  ;;  %v1178_v43 = vpop.eup %1177  ;;  %v465_v15 = vor.u32 1.1754944e-38, %v464_v2 }
 0x1cc   :  { %v836_v40 = vpop.f32.mrf.mxu0  ;;  %v1180_v47 = vpop.eup %1179  ;;  %1187 = vpow2.f32 %v1098_v38  ;;  %v1094_v48 = vmul.f32 -1.442695, %v393_v45  ;;  %v1856_v58 = vadd.f32 1.0, %v1178_v43 }
 0x1cd   :  { %v442_v49 = vadd.f32 %v1174_v27, %v441_v46  ;;  %v1847_v52 = vadd.f32 1.0, %v1180_v47  ;;  %1189 = vpow2.f32 %v1107_v42  ;;  %v1124_v55 = vmul.f32 -1.442695, %v836_v40 }
 0x1ce   :  { %v1845_v51 = vpop.eup %1181  ;;  %1191 = vrcp.f32 %v1842_v36 }
 0x1cf   :  { %v1184_v54 = vpop.eup %1183  ;;  %v454_v41 = vmul.f32 %v1845_v51, %v1837_v30  ;;  %1193 = vrcp.f32 %v1847_v52  ;;  %v446_v61 = vsel %vm1850_vm13, %v1174_v27, %v442_v49  ;;  %vm459_vm15 = vweird.f32 %v1845_v51 }
 0x1d0   :  { %v1859_v60 = vadd.f32 1.0, %v1184_v54  ;;  %1195 = vpow2.f32 %v1094_v48  ;;  %v1863_v0 = vpop.eup %1185  ;;  %v451_v4 = vsel %vm448_vm14, %v450_v35, %v446_v61  ;;  %v479_v22 = vand.u32 2147483648, %v1847_v52  ;;  %vm1897_vm4 = vmor %vm458_vm1, %vm459_vm15 }
 0x1d1   :  { %v612_v62 = vpop.f32.mrf.mxu2  ;;  %v455_v39 = vsub.f32 1.0, %v454_v41  ;;  %v1892_v29 = vmul.f32 %v1863_v0, %v1839_v32  ;;  %v477_v20 = vand.u32 2147483647, %v1847_v52  ;;  %vm473_vm14 = vweird.f32 %v1847_v52 }
 0x1d2   :  { %1197 = vrcp.f32 %v1859_v60  ;;  %v1868_v3 = vpop.eup %1187  ;;  %v1108_v44 = vmul.f32 -1.442695, %v612_v62  ;;  %v895_v8 = vand.u32 2147483647, %v1859_v60  ;;  %v897_v12 = vand.u32 2147483648, %v1859_v60 }
 0x1d3   :  { %1199 = vpow2.f32 %v1124_v55  ;;  %v570_v5 = vpop.f32.mrf.mxu1  ;;  %v456_v6 = vmul.f32 %v1845_v51, %v455_v39  ;;  %v1190_v7 = vpop.eup %1189  ;;  %vm891_vm3 = vweird.f32 %v1859_v60  ;;  %v1915_v18 = vor.u32 1.1754944e-38, %v479_v22 }
 0x1d4   :  { %1201 = vrcp.f32 %v1856_v58  ;;  %v590_v9 = vmul.f32 %v570_v5, %v451_v4  ;;  %v839_v10 = vpop.f32.mrf.mxu0  ;;  %v1874_v11 = vpop.eup %1191  ;;  %v1877_v56 = vadd.f32 1.0, %v1190_v7  ;;  %vm1903_vm5 = vcmp.eq.f32.partialorder %v895_v8, 8.507059e+37 }
 0x1d5   :  { %v1125_v59 = vmul.f32 -1.442695, %v839_v10  ;;  %v457_v63 = vadd.f32 %v1845_v51, %v456_v6  ;;  %v1880_v28 = vpop.eup %1193  ;;  %1203 = vpow2.f32 %v1108_v44  ;;  %v898_v24 = vor.u32 1.1754944e-38, %v897_v12  ;;  %v794_v7 = vpop.f32.mrf.mxu3 }
 0x1d6   :  { %1006 = vst.msk [vmem:[#allocation14] sm:$0xff] %vm152_vm0, %v590_v9  ;;  %v1196_v13 = vpop.eup %1195  ;;  %1205 = vrcp.f32 %v1877_v56  ;;  %v671_v31 = vand.u32 2147483647, %v1877_v56  ;;  %v673_v38 = vand.u32 2147483648, %v1877_v56  ;;  %v500_v45 = vsub.f32 1.0, %v1892_v29 }
 0x1d7   :  { %1207 = vpow2.f32 %v1125_v59  ;;  %v461_v26 = vsel %vm1897_vm4, %v1845_v51, %v457_v63  ;;  %v1917_v37 = vadd.f32 1.0, %v1196_v13  ;;  %v469_v47 = vmul.f32 %v1880_v28, %v1847_v52 }
 0x1d8   :  { %v1198_v16 = vpop.eup %1197  ;;  %v466_v43 = vsel %vm1886_vm2, %v465_v15, %v461_v26  ;;  %vm667_vm7 = vweird.f32 %v1877_v56  ;;  %vm1931_vm8 = vcmp.eq.f32.partialorder %v671_v31, 8.507059e+37  ;;  %v674_v39 = vor.u32 1.1754944e-38, %v673_v38 }
 0x1d9   :  { %v1200_v21 = vpop.eup %1199  ;;  %v887_v19 = vmul.f32 %v1198_v16, %v1859_v60  ;;  %v615_v25 = vpop.f32.mrf.mxu2  ;;  %vm892_vm6 = vweird.f32 %v1198_v16  ;;  %v470_v4 = vsub.f32 1.0, %v469_v47  ;;  %vm474_vm10 = vweird.f32 %v1880_v28 }
 0x1da   :  { %v1910_v27 = vpop.eup %1201  ;;  %v1912_v30 = vadd.f32 1.0, %v1200_v21  ;;  %v1109_v33 = vmul.f32 -1.442695, %v615_v25  ;;  %vm893_vm9 = vmor %vm891_vm3, %vm892_vm6  ;;  %vm1977_vm4 = vcmp.eq.f32.partialorder %v477_v20, 8.507059e+37 }
 0x1db   :  { %v888_v34 = vsub.f32 1.0, %v887_v19  ;;  %v572_v42 = vpop.f32.mrf.mxu1  ;;  %v1204_v46 = vpop.eup %1203  ;;  %v471_v23 = vmul.f32 %v1880_v28, %v470_v4 }
 0x1dc   :  { %1209 = vrcp.f32 %v1912_v30  ;;  %v841_v40 = vpop.f32.mrf.mxu0  ;;  %v1206_v48 = vpop.eup %1205  ;;  %v1926_v50 = vadd.f32 1.0, %v1204_v46  ;;  %v591_v51 = vmul.f32 %v572_v42, %v466_v43  ;;  %v910_v54 = vand.u32 2147483647, %v1912_v30 }
 0x1dd   :  { %v889_v49 = vmul.f32 %v1198_v16, %v888_v34  ;;  %1211 = vpow2.f32 %v1109_v33  ;;  %v1208_v53 = vpop.eup %1207  ;;  %v663_v55 = vmul.f32 %v1206_v48, %v1877_v56  ;;  %v912_v61 = vand.u32 2147483648, %v1912_v30 }
 0x1de   :  { %1213 = vrcp.f32 %v1926_v50  ;;  %v1937_v62 = vadd.f32 1.0, %v1208_v53  ;;  %1007 = vst.msk [vmem:[#allocation14 + $0x8] sm:$0xff] %vm152_vm0, %v591_v51  ;;  %v1126_v1 = vmul.f32 -1.442695, %v841_v40  ;;  %vm906_vm11 = vweird.f32 %v1912_v30 }
 0x1df   :  { %v890_v41 = vadd.f32 %v1198_v16, %v889_v49  ;;  %1215 = vrcp.f32 %v1917_v37  ;;  %v664_v35 = vsub.f32 1.0, %v663_v55  ;;  %vm668_vm12 = vweird.f32 %v1206_v48 }
 0x1e0   :  { %1217 = vrcp.f32 %v1937_v62  ;;  %vm1951_vm13 = vcmp.eq.f32.partialorder %v910_v54, 8.507059e+37  ;;  %v913_v12 = vor.u32 1.1754944e-38, %v912_v61  ;;  %v686_v59 = vand.u32 2147483647, %v1926_v50  ;;  %vm669_vm1 = vmor %vm667_vm7, %vm668_vm12 }
 0x1e1   :  { %v894_v2 = vsel %vm893_vm9, %v1198_v16, %v890_v41  ;;  %v617_v44 = vpop.f32.mrf.mxu2  ;;  %v665_v60 = vmul.f32 %v1206_v48, %v664_v35  ;;  %v688_v63 = vand.u32 2147483648, %v1926_v50  ;;  %v925_v13 = vand.u32 2147483647, %v1937_v62 }
 0x1e2   :  { %v1210_v5 = vpop.eup %1209  ;;  %v899_v6 = vsel %vm1903_vm5, %v898_v24, %v894_v2  ;;  %vm682_vm15 = vweird.f32 %v1926_v50  ;;  %1219 = vpow2.f32 %v1126_v1  ;;  %v927_v21 = vand.u32 2147483648, %v1937_v62  ;;  %v796_v2 = vpop.f32.mrf.mxu3 }
 0x1e3   :  { %v1212_v8 = vpop.eup %1211  ;;  %1022 = vst.msk [vmem:[#allocation17] sm:$0xff] %vm152_vm0, %v899_v6  ;;  %v902_v9 = vmul.f32 %v1210_v5, %v1912_v30  ;;  %v666_v22 = vadd.f32 %v1206_v48, %v665_v60  ;;  %v1110_v19 = vmul.f32 -1.442695, %v617_v44  ;;  %vm907_vm2 = vweird.f32 %v1210_v5 }
 0x1e4   :  { %v1959_v14 = vadd.f32 1.0, %v1212_v8  ;;  %v844_v16 = vpop.f32.mrf.mxu0  ;;  %v1214_v17 = vpop.eup %1213  ;;  %vm921_vm3 = vweird.f32 %v1937_v62  ;;  %vm1981_vm5 = vcmp.eq.f32.partialorder %v925_v13, 8.507059e+37  ;;  %vm1985_vm6 = vcmp.eq.f32.partialorder %v686_v59, 8.507059e+37  ;;  %vm908_vm7 = vmor %vm906_vm11, %vm907_vm2 }
 0x1e5   :  { %v903_v15 = vsub.f32 1.0, %v902_v9  ;;  %v1967_v24 = vpop.eup %1215  ;;  %v670_v25 = vsel %vm669_vm1, %v1206_v48, %v666_v22  ;;  %v678_v26 = vmul.f32 %v1214_v17, %v1926_v50  ;;  %v1127_v31 = vmul.f32 -1.442695, %v844_v16  ;;  %vm2003_vm11 = vmor %vm473_vm14, %vm474_vm10  ;;  %v575_v59 = vpop.f32.mrf.mxu1 }
 0x1e6   :  { %1221 = vrcp.f32 %v1959_v14  ;;  %v1218_v33 = vpop.eup %1217  ;;  %v675_v56 = vsel %vm1931_vm8, %v674_v39, %v670_v25  ;;  %v472_v49 = vadd.f32 %v1880_v28, %v471_v23  ;;  %vm683_vm8 = vweird.f32 %v1214_v17 }
 0x1e7   :  { %v904_v34 = vmul.f32 %v1210_v5, %v903_v15  ;;  %1223 = vpow2.f32 %v1110_v19  ;;  %v814_v38 = vmul.f32 %v794_v7, %v675_v56  ;;  %v917_v42 = vmul.f32 %v1218_v33, %v1937_v62  ;;  %vm684_vm12 = vmor %vm682_vm15, %vm683_vm8 }
 0x1e8   :  { %v679_v46 = vsub.f32 1.0, %v678_v26  ;;  %v1220_v51 = vpop.eup %1219  ;;  %1225 = vpow2.f32 %v1127_v31  ;;  %v928_v57 = vor.u32 1.1754944e-38, %v927_v21  ;;  %v689_v41 = vor.u32 1.1754944e-38, %v688_v63 }
 0x1e9   :  { %v905_v40 = vadd.f32 %v1210_v5, %v904_v34  ;;  %1014 = vst.msk [vmem:[#allocation15] sm:$0xff] %vm152_vm0, %v814_v38  ;;  %v918_v20 = vsub.f32 1.0, %v917_v42  ;;  %v620_v54 = vpop.f32.mrf.mxu2  ;;  %v1993_v61 = vadd.f32 1.0, %v1220_v51  ;;  %vm922_vm9 = vweird.f32 %v1218_v33 }
 0x1ea   :  { %v680_v53 = vmul.f32 %v1214_v17, %v679_v46  ;;  %v476_v6 = vsel %vm2003_vm11, %v1880_v28, %v472_v49  ;;  %v1111_v52 = vmul.f32 -1.442695, %v620_v54  ;;  %vm923_vm10 = vmor %vm921_vm3, %vm922_vm9  ;;  %v703_v28 = vand.u32 2147483648, %v1959_v14  ;;  %v799_v47 = vpop.f32.mrf.mxu3 }
 0x1eb   :  { %v909_v55 = vsel %vm908_vm7, %v1210_v5, %v905_v40  ;;  %v919_v1 = vmul.f32 %v1218_v33, %v918_v20  ;;  %1227 = vrcp.f32 %v1993_v61  ;;  %v701_v5 = vand.u32 2147483647, %v1959_v14 }
 0x1ec   :  { %v1995_v35 = vpop.eup %1221  ;;  %v914_v39 = vsel %vm1951_vm13, %v913_v12, %v909_v55  ;;  %v681_v30 = vadd.f32 %v1214_v17, %v680_v53  ;;  %v940_v10 = vand.u32 2147483647, %v1993_v61  ;;  %v942_v12 = vand.u32 2147483648, %v1993_v61  ;;  %v846_v49 = vpop.f32.mrf.mxu0 }
 0x1ed   :  { %v1224_v4 = vpop.eup %1223  ;;  %1023 = vst.msk [vmem:[#allocation17 + $0x8] sm:$0xff] %vm152_vm0, %v914_v39  ;;  %v920_v60 = vadd.f32 %v1218_v33, %v919_v1  ;;  %v693_v9 = vmul.f32 %v1995_v35, %v1959_v14  ;;  %vm697_vm13 = vweird.f32 %v1959_v14  ;;  %vm698_vm14 = vweird.f32 %v1995_v35 }
 0x1ee   :  { %v685_v7 = vsel %vm684_vm12, %v1214_v17, %v681_v30  ;;  %v2016_v8 = vadd.f32 1.0, %v1224_v4  ;;  %v1226_v63 = vpop.eup %1225  ;;  %v481_v17 = vsel %vm1977_vm4, %v1915_v18, %v476_v6  ;;  %vm2041_vm15 = vcmp.eq.f32.partialorder %v701_v5, 8.507059e+37  ;;  %vm699_vm4 = vmor %vm697_vm13, %vm698_vm14 }
 0x1ef   :  { %v690_v50 = vsel %vm1985_vm6, %v689_v41, %v685_v7  ;;  %v924_v22 = vsel %vm923_vm10, %v1218_v33, %v920_v60  ;;  %v694_v16 = vsub.f32 1.0, %v693_v9  ;;  %v2034_v15 = vadd.f32 1.0, %v1226_v63 }
 0x1f0   :  { %v815_v13 = vmul.f32 %v796_v2, %v690_v50  ;;  %1229 = vrcp.f32 %v2016_v8  ;;  %v929_v62 = vsel %vm1981_vm5, %v928_v57, %v924_v22  ;;  %v592_v19 = vmul.f32 %v575_v59, %v481_v17 }
 0x1f1   :  { %1231 = vpow2.f32 %v1111_v52  ;;  %1024 = vst.msk [vmem:[#allocation17 + $0x10] sm:$0xff] %vm152_vm0, %v929_v62  ;;  %v695_v21 = vmul.f32 %v1995_v35, %v694_v16  ;;  %v1228_v23 = vpop.eup %1227  ;;  %v704_v18 = vor.u32 1.1754944e-38, %v703_v28  ;;  %v716_v26 = vand.u32 2147483647, %v2016_v8  ;;  %v622_v39 = vpop.f32.mrf.mxu2 }
 0x1f2   :  { %1015 = vst.msk [vmem:[#allocation15 + $0x8] sm:$0xff] %vm152_vm0, %v815_v13  ;;  %1233 = vrcp.f32 %v2034_v15  ;;  %v932_v31 = vmul.f32 %v1228_v23, %v1993_v61  ;;  %vm936_vm1 = vweird.f32 %v1993_v61  ;;  %vm2049_vm2 = vcmp.eq.f32.partialorder %v940_v10, 8.507059e+37  ;;  %v577_v10 = vpop.f32.mrf.mxu1  ;;  %v801_v25 = vpop.f32.mrf.mxu3 }
 0x1f3   :  { %v696_v34 = vadd.f32 %v1995_v35, %v695_v21  ;;  %1008 = vst.msk [vmem:[#allocation14 + $0x10] sm:$0xff] %vm152_vm0, %v592_v19  ;;  %vm488_vm3 = vweird.f32 %v1917_v37  ;;  %v943_v56 = vor.u32 1.1754944e-38, %v942_v12  ;;  %v955_v38 = vand.u32 2147483647, %v2034_v15 }
 0x1f4   :  { %vm712_vm5 = vweird.f32 %v2016_v8  ;;  %v484_v42 = vmul.f32 %v1967_v24, %v1917_v37  ;;  %v933_v43 = vsub.f32 1.0, %v932_v31  ;;  %vm937_vm6 = vweird.f32 %v1228_v23 }
 0x1f5   :  { %v700_v40 = vsel %vm699_vm4, %v1995_v35, %v696_v34  ;;  %v957_v48 = vand.u32 2147483648, %v2034_v15  ;;  %vm2069_vm7 = vcmp.eq.f32.partialorder %v716_v26, 8.507059e+37  ;;  %v718_v54 = vand.u32 2147483648, %v2016_v8  ;;  %vm938_vm11 = vmor %vm936_vm1, %vm937_vm6 }
 0x1f6   :  { %v1230_v46 = vpop.eup %1229  ;;  %v705_v14 = vsel %vm2041_vm15, %v704_v18, %v700_v40  ;;  %v934_v55 = vmul.f32 %v1228_v23, %v933_v43  ;;  %vm951_vm8 = vweird.f32 %v2034_v15  ;;  %v485_v35 = vsub.f32 1.0, %v484_v42  ;;  %v849_v18 = vpop.f32.mrf.mxu0 }
 0x1f7   :  { %v1232_v51 = vpop.eup %1231  ;;  %v708_v20 = vmul.f32 %v1230_v46, %v2016_v8  ;;  %v816_v57 = vmul.f32 %v799_v47, %v705_v14  ;;  %vm489_vm9 = vweird.f32 %v1967_v24  ;;  %v492_v2 = vand.u32 2147483647, %v1917_v37 }
 0x1f8   :  { %v2075_v41 = vadd.f32 1.0, %v1232_v51  ;;  %v1234_v1 = vpop.eup %1233  ;;  %v1128_v44 = vmul.f32 -1.442695, %v846_v49  ;;  %v935_v4 = vadd.f32 %v1228_v23, %v934_v55  ;;  %v494_v6 = vand.u32 2147483648, %v1917_v37  ;;  %vm2095_vm14 = vmor %vm488_vm3, %vm489_vm9 }
 0x1f9   :  { %v709_v30 = vsub.f32 1.0, %v708_v20  ;;  %1016 = vst.msk [vmem:[#allocation15 + $0x10] sm:$0xff] %vm152_vm0, %v816_v57  ;;  %v947_v5 = vmul.f32 %v1234_v1, %v2034_v15  ;;  %vm713_vm12 = vweird.f32 %v1230_v46  ;;  %v486_v60 = vmul.f32 %v1967_v24, %v485_v35  ;;  %v625_v42 = vpop.f32.mrf.mxu2 }
 0x1fa   :  { %1235 = vrcp.f32 %v2075_v41  ;;  %vm503_vm10 = vweird.f32 %v1839_v32  ;;  %v939_v7 = vsel %vm938_vm11, %v1228_v23, %v935_v4  ;;  %v719_v50 = vor.u32 1.1754944e-38, %v718_v54  ;;  %vm714_vm15 = vmor %vm712_vm5, %vm713_vm12  ;;  %v580_v55 = vpop.f32.mrf.mxu1  ;;  %v804_v4 = vpop.f32.mrf.mxu3 }
 0x1fb   :  { %v710_v52 = vmul.f32 %v1230_v46, %v709_v30  ;;  %1237 = vpow2.f32 %v1128_v44  ;;  %v948_v9 = vsub.f32 1.0, %v947_v5  ;;  %v1112_v12 = vmul.f32 -1.442695, %v622_v39 }
 0x1fc   :  { %v944_v28 = vsel %vm2049_vm2, %v943_v56, %v939_v7  ;;  %vm952_vm13 = vweird.f32 %v1234_v1  ;;  %v487_v61 = vadd.f32 %v1967_v24, %v486_v60  ;;  %v495_v13 = vor.u32 1.1754944e-38, %v494_v6 }
 0x1fd   :  { %v711_v59 = vadd.f32 %v1230_v46, %v710_v52  ;;  %1025 = vst.msk [vmem:[#allocation17 + $0x18] sm:$0xff] %vm152_vm0, %v944_v28  ;;  %v949_v22 = vmul.f32 %v1234_v1, %v948_v9  ;;  %1239 = vpow2.f32 %v1112_v12  ;;  %v501_v16 = vmul.f32 %v1863_v0, %v500_v45  ;;  %vm953_vm3 = vmor %vm951_vm8, %vm952_vm13 }
 0x1fe   :  { %vm2106_vm1 = vcmp.eq.f32.partialorder %v955_v38, 8.507059e+37  ;;  %v491_v17 = vsel %vm2095_vm14, %v1967_v24, %v487_v61  ;;  %vm493_vm2 = vcmp.eq.f32.partialorder %v492_v2, 8.507059e+37  ;;  %v958_v8 = vor.u32 1.1754944e-38, %v957_v48  ;;  %v851_v6 = vpop.f32.mrf.mxu0 }
 0x1ff   :  { %v715_v37 = vsel %vm714_vm15, %v1230_v46, %v711_v59  ;;  %v950_v19 = vadd.f32 %v1234_v1, %v949_v22  ;;  %v496_v29 = vsel %vm493_vm2, %v495_v13, %v491_v17  ;;  %vm504_vm4 = vweird.f32 %v1863_v0 }
 0x200   :  { %v1236_v21 = vpop.eup %1235  ;;  %v720_v23 = vsel %vm2069_vm7, %v719_v50, %v715_v37  ;;  %v593_v31 = vmul.f32 %v577_v10, %v496_v29  ;;  %v502_v56 = vadd.f32 %v1863_v0, %v501_v16  ;;  %v507_v38 = vand.u32 2147483647, %v1839_v32  ;;  %vm2136_vm5 = vmor %vm503_vm10, %vm504_vm4 }
 0x201   :  { %v1238_v45 = vpop.eup %1237  ;;  %v817_v26 = vmul.f32 %v801_v25, %v720_v23  ;;  %v723_v33 = vmul.f32 %v1236_v21, %v2075_v41  ;;  %v954_v24 = vsel %vm953_vm3, %v1234_v1, %v950_v19  ;;  %v509_v43 = vand.u32 2147483648, %v1839_v32  ;;  %v627_v28 = vpop.f32.mrf.mxu2 }
 0x202   :  { %v2120_v34 = vadd.f32 1.0, %v1238_v45  ;;  %v959_v46 = vsel %vm2106_vm1, %v958_v8, %v954_v24  ;;  %v1129_v40 = vmul.f32 -1.442695, %v849_v18  ;;  %v731_v48 = vand.u32 2147483647, %v2075_v41  ;;  %1009 = vst.msk [vmem:[#allocation14 + $0x18] sm:$0xff] %vm152_vm0, %v593_v31  ;;  %v582_v45 = vpop.f32.mrf.mxu1 }
 0x203   :  { %1017 = vst.msk [vmem:[#allocation15 + $0x18] sm:$0xff] %vm152_vm0, %v817_v26  ;;  %v724_v15 = vsub.f32 1.0, %v723_v33  ;;  %v1240_v47 = vpop.eup %1239  ;;  %v733_v49 = vand.u32 2147483648, %v2075_v41  ;;  %vm728_vm6 = vweird.f32 %v1236_v21  ;;  %v506_v53 = vsel %vm2136_vm5, %v1863_v0, %v502_v56 }
 0x204   :  { %1026 = vst.msk [vmem:[#allocation17 + $0x20] sm:$0xff] %vm152_vm0, %v959_v46  ;;  %1241 = vrcp.f32 %v2120_v34  ;;  %v2141_v14 = vadd.f32 1.0, %v1240_v47  ;;  %v2147_v54 = vadd.f32 1.0, %v1868_v3  ;;  %vm727_vm7 = vweird.f32 %v2075_v41 }
 0x205   :  { %v725_v20 = vmul.f32 %v1236_v21, %v724_v15  ;;  %v510_v32 = vor.u32 1.1754944e-38, %v509_v43  ;;  %1243 = vpow2.f32 %v1129_v40  ;;  %vm508_vm8 = vcmp.eq.f32.partialorder %v507_v38, 8.507059e+37  ;;  %vm729_vm9 = vmor %vm727_vm7, %vm728_vm6 }
 0x206   :  { %1245 = vrcp.f32 %v2141_v14  ;;  %v1113_v35 = vmul.f32 -1.442695, %v625_v42  ;;  %v972_v39 = vand.u32 2147483648, %v2120_v34  ;;  %v734_v1 = vor.u32 1.1754944e-38, %v733_v49 }
 0x207   :  { %v726_v57 = vadd.f32 %v1236_v21, %v725_v20  ;;  %v511_v30 = vsel %vm508_vm8, %v510_v32, %v506_v53  ;;  %v514_v0 = vmul.f32 %v1874_v11, %v1842_v36  ;;  %vm732_vm11 = vcmp.eq.f32.partialorder %v731_v48, 8.507059e+37  ;;  %v806_v20 = vpop.f32.mrf.mxu3 }
 0x208   :  { %v594_v2 = vmul.f32 %v580_v55, %v511_v30  ;;  %1247 = vpow2.f32 %v1113_v35  ;;  %vm966_vm12 = vweird.f32 %v2120_v34  ;;  %v970_v60 = vand.u32 2147483647, %v2120_v34 }
 0x209   :  { %v730_v3 = vsel %vm729_vm9, %v1236_v21, %v726_v57  ;;  %1249 = vrcp.f32 %v2147_v54  ;;  %v515_v5 = vsub.f32 1.0, %v514_v0  ;;  %v973_v50 = vor.u32 1.1754944e-38, %v972_v39 }
 0x20a   :  { %v1242_v41 = vpop.eup %1241  ;;  %v735_v44 = vsel %vm732_vm11, %v734_v1, %v730_v3  ;;  %1010 = vst.msk [vmem:[#allocation14 + $0x20] sm:$0xff] %vm152_vm0, %v594_v2  ;;  %v746_v10 = vand.u32 2147483647, %v2141_v14  ;;  %vm519_vm10 = vweird.f32 %v1874_v11  ;;  %v524_v22 = vand.u32 2147483648, %v1842_v36 }
 0x20b   :  { %v962_v52 = vmul.f32 %v1242_v41, %v2120_v34  ;;  %v818_v7 = vmul.f32 %v804_v4, %v735_v44  ;;  %v1244_v9 = vpop.eup %1243  ;;  %v516_v12 = vmul.f32 %v1874_v11, %v515_v5  ;;  %v1130_v13 = vmul.f32 -1.442695, %v851_v6  ;;  %v585_v5 = vpop.f32.mrf.mxu1 }
 0x20c   :  { %v1246_v59 = vpop.eup %1245  ;;  %v2163_v63 = vadd.f32 1.0, %v1244_v9  ;;  %vm518_vm13 = vweird.f32 %v1842_v36  ;;  %v522_v37 = vand.u32 2147483647, %v1842_v36  ;;  %vm967_vm14 = vweird.f32 %v1242_v41 }
 0x20d   :  { %v963_v61 = vsub.f32 1.0, %v962_v52  ;;  %1018 = vst.msk [vmem:[#allocation15 + $0x20] sm:$0xff] %vm152_vm0, %v818_v7  ;;  %v738_v16 = vmul.f32 %v1246_v59, %v2141_v14  ;;  %v517_v62 = vadd.f32 %v1874_v11, %v516_v12  ;;  %vm2173_vm15 = vmor %vm518_vm13, %vm519_vm10  ;;  %v1114_v8 = vmul.f32 -1.442695, %v627_v28 }
 0x20e   :  { %v1248_v17 = vpop.eup %1247  ;;  %1251 = vrcp.f32 %v2163_v63  ;;  %v748_v18 = vand.u32 2147483648, %v2141_v14  ;;  %v525_v31 = vor.u32 1.1754944e-38, %v524_v22  ;;  %v529_v33 = vmul.f32 %v1910_v27, %v1856_v58  ;;  %vm968_vm1 = vmor %vm966_vm12, %vm967_vm14 }
 0x20f   :  { %v964_v21 = vmul.f32 %v1242_v41, %v963_v61  ;;  %v2177_v23 = vpop.eup %1249  ;;  %v2179_v25 = vadd.f32 1.0, %v1248_v17  ;;  %v739_v29 = vsub.f32 1.0, %v738_v16  ;;  %v521_v36 = vsel %vm2173_vm15, %v1874_v11, %v517_v62  ;;  %v809_v19 = vpop.f32.mrf.mxu3 }
 0x210   :  { %1253 = vpow2.f32 %v1130_v13  ;;  %vm743_vm2 = vweird.f32 %v1246_v59  ;;  %vm523_vm3 = vcmp.eq.f32.partialorder %v522_v37, 8.507059e+37  ;;  %vm971_vm4 = vcmp.eq.f32.partialorder %v970_v60, 8.507059e+37 }
 0x211   :  { %v965_v26 = vadd.f32 %v1242_v41, %v964_v21  ;;  %1255 = vrcp.f32 %v2179_v25  ;;  %v740_v24 = vmul.f32 %v1246_v59, %v739_v29  ;;  %v526_v38 = vsel %vm523_vm3, %v525_v31, %v521_v36 }
 0x212   :  { %1257 = vpow2.f32 %v1114_v8  ;;  %vm742_vm5 = vweird.f32 %v2141_v14  ;;  %v595_v46 = vmul.f32 %v582_v45, %v526_v38  ;;  %vm981_vm6 = vweird.f32 %v2163_v63 }
 0x213   :  { %v969_v56 = vsel %vm968_vm1, %v1242_v41, %v965_v26  ;;  %v741_v42 = vadd.f32 %v1246_v59, %v740_v24  ;;  %vm744_vm7 = vmor %vm742_vm5, %vm743_vm2  ;;  %vm747_vm8 = vcmp.eq.f32.partialorder %v746_v10, 8.507059e+37  ;;  %v749_v34 = vor.u32 1.1754944e-38, %v748_v18 }
 0x214   :  { %v974_v11 = vsel %vm971_vm4, %v973_v50, %v969_v56  ;;  %v1252_v15 = vpop.eup %1251  ;;  %v530_v43 = vsub.f32 1.0, %v529_v33  ;;  %v985_v47 = vand.u32 2147483647, %v2163_v63  ;;  %v987_v48 = vand.u32 2147483648, %v2163_v63  ;;  %1011 = vst.msk [vmem:[#allocation14 + $0x28] sm:$0xff] %vm152_vm0, %v595_v46  ;;  %v587_v56 = vpop.f32.mrf.mxu1 }
 0x215   :  { %1027 = vst.msk [vmem:[#allocation17 + $0x28] sm:$0xff] %vm152_vm0, %v974_v11  ;;  %v977_v40 = vmul.f32 %v1252_v15, %v2163_v63  ;;  %v745_v49 = vsel %vm744_vm7, %v1246_v59, %v741_v42  ;;  %vm534_vm9 = vweird.f32 %v1910_v27  ;;  %v539_v32 = vand.u32 2147483648, %v1856_v58 }
 0x216   :  { %v1254_v51 = vpop.eup %1253  ;;  %v750_v14 = vsel %vm747_vm8, %v749_v34, %v745_v49  ;;  %v531_v53 = vmul.f32 %v1910_v27, %v530_v43  ;;  %v544_v1 = vmul.f32 %v2177_v23, %v2147_v54  ;;  %vm533_vm11 = vweird.f32 %v1856_v58 }
 0x217   :  { %v1256_v55 = vpop.eup %1255  ;;  %v978_v57 = vsub.f32 1.0, %v977_v40  ;;  %v819_v35 = vmul.f32 %v806_v20, %v750_v14  ;;  %v2200_v39 = vadd.f32 1.0, %v1254_v51  ;;  %v537_v2 = vand.u32 2147483647, %v1856_v58  ;;  %vm2212_vm10 = vmor %vm533_vm11, %vm534_vm9 }
 0x218   :  { %v1258_v30 = vpop.eup %1257  ;;  %v753_v0 = vmul.f32 %v1256_v55, %v2179_v25  ;;  %v532_v3 = vadd.f32 %v1910_v27, %v531_v53  ;;  %vm982_vm12 = vweird.f32 %v1252_v15  ;;  %v988_v44 = vor.u32 1.1754944e-38, %v987_v48  ;;  %v811_v53 = vpop.f32.mrf.mxu3 }
 0x219   :  { %v979_v41 = vmul.f32 %v1252_v15, %v978_v57  ;;  %1019 = vst.msk [vmem:[#allocation15 + $0x28] sm:$0xff] %vm152_vm0, %v819_v35  ;;  %1259 = vrcp.f32 %v2200_v39  ;;  %v2216_v6 = vadd.f32 1.0, %v1258_v30  ;;  %v761_v60 = vand.u32 2147483647, %v2179_v25  ;;  %vm983_vm13 = vmor %vm981_vm6, %vm982_vm12 }
 0x21a   :  { %v754_v52 = vsub.f32 1.0, %v753_v0  ;;  %v536_v58 = vsel %vm2212_vm10, %v1910_v27, %v532_v3  ;;  %v763_v9 = vand.u32 2147483648, %v2179_v25  ;;  %v540_v50 = vor.u32 1.1754944e-38, %v539_v32 }
 0x21b   :  { %v980_v7 = vadd.f32 %v1252_v15, %v979_v41  ;;  %v545_v10 = vsub.f32 1.0, %v544_v1  ;;  %1261 = vrcp.f32 %v2216_v6  ;;  %vm758_vm14 = vweird.f32 %v1256_v55 }
 0x21c   :  { %v755_v12 = vmul.f32 %v1256_v55, %v754_v52  ;;  %vm538_vm15 = vcmp.eq.f32.partialorder %v537_v2, 8.507059e+37  ;;  %vm986_vm1 = vcmp.eq.f32.partialorder %v985_v47, 8.507059e+37  ;;  %vm757_vm2 = vweird.f32 %v2179_v25 }
 0x21d   :  { %v984_v28 = vsel %vm983_vm13, %v1252_v15, %v980_v7  ;;  %v541_v59 = vsel %vm538_vm15, %v540_v50, %v536_v58  ;;  %v546_v13 = vmul.f32 %v2177_v23, %v545_v10  ;;  %vm759_vm3 = vmor %vm757_vm2, %vm758_vm14  ;;  %vm762_vm4 = vcmp.eq.f32.partialorder %v761_v60, 8.507059e+37 }
 0x21e   :  { %v989_v61 = vsel %vm986_vm1, %v988_v44, %v984_v28  ;;  %v756_v27 = vadd.f32 %v1256_v55, %v755_v12  ;;  %v596_v22 = vmul.f32 %v585_v5, %v541_v59  ;;  %v764_v63 = vor.u32 1.1754944e-38, %v763_v9 }
 0x21f   :  { %v1260_v16 = vpop.eup %1259  ;;  %1028 = vst.msk [vmem:[#allocation17 + $0x30] sm:$0xff] %vm152_vm0, %v989_v61  ;;  %vm549_vm5 = vweird.f32 %v2177_v23  ;;  %v547_v17 = vadd.f32 %v2177_v23, %v546_v13  ;;  %vm548_vm6 = vweird.f32 %v2147_v54  ;;  %v552_v25 = vand.u32 2147483647, %v2147_v54 }
 0x220   :  { %v992_v62 = vmul.f32 %v1260_v16, %v2200_v39  ;;  %v760_v37 = vsel %vm759_vm3, %v1256_v55, %v756_v27  ;;  %1012 = vst.msk [vmem:[#allocation14 + $0x30] sm:$0xff] %vm152_vm0, %v596_v22  ;;  %vm2234_vm7 = vmor %vm548_vm6, %vm549_vm5  ;;  %v554_v29 = vand.u32 2147483648, %v2147_v54  ;;  %v1002_v31 = vand.u32 2147483648, %v2200_v39 }
 0x221   :  { %v765_v21 = vsel %vm762_vm4, %v764_v63, %v760_v37  ;;  %v1262_v18 = vpop.eup %1261  ;;  %v551_v26 = vsel %vm2234_vm7, %v2177_v23, %v547_v17  ;;  %vm997_vm8 = vweird.f32 %v1260_v16  ;;  %v1000_v38 = vand.u32 2147483647, %v2200_v39 }
 0x222   :  { %v993_v36 = vsub.f32 1.0, %v992_v62  ;;  %v820_v45 = vmul.f32 %v809_v19, %v765_v21  ;;  %v768_v33 = vmul.f32 %v1262_v18, %v2216_v6  ;;  %v555_v24 = vor.u32 1.1754944e-38, %v554_v29 }
 0x223   :  { %vm553_vm9 = vcmp.eq.f32.partialorder %v552_v25, 8.507059e+37  ;;  %vm996_vm11 = vweird.f32 %v2200_v39  ;;  %v778_v46 = vand.u32 2147483648, %v2216_v6  ;;  %v1003_v34 = vor.u32 1.1754944e-38, %v1002_v31 }
 0x224   :  { %v994_v54 = vmul.f32 %v1260_v16, %v993_v36  ;;  %1020 = vst.msk [vmem:[#allocation15 + $0x30] sm:$0xff] %vm152_vm0, %v820_v45  ;;  %v769_v23 = vsub.f32 1.0, %v768_v33  ;;  %v556_v11 = vsel %vm553_vm9, %v555_v24, %v551_v26  ;;  %vm998_vm12 = vmor %vm996_vm11, %vm997_vm8  ;;  %vm773_vm10 = vweird.f32 %v1262_v18 }
 0x225   :  { %v597_v15 = vmul.f32 %v587_v56, %v556_v11  ;;  %v776_v40 = vand.u32 2147483647, %v2216_v6  ;;  %vm1001_vm13 = vcmp.eq.f32.partialorder %v1000_v38, 8.507059e+37  ;;  %vm772_vm14 = vweird.f32 %v2216_v6 }
 0x226   :  { %v995_v42 = vadd.f32 %v1260_v16, %v994_v54  ;;  %v770_v43 = vmul.f32 %v1262_v18, %v769_v23  ;;  %vm774_vm15 = vmor %vm772_vm14, %vm773_vm10  ;;  %v779_v51 = vor.u32 1.1754944e-38, %v778_v46 }
 0x227   :  { %1013 = vst.msk [vmem:[#allocation14 + $0x38] sm:$0xff] %vm152_vm0, %v597_v15  ;;  %vm777_vm1 = vcmp.eq.f32.partialorder %v776_v40, 8.507059e+37 }
 0x228   :  { %v999_v47 = vsel %vm998_vm12, %v1260_v16, %v995_v42  ;;  %v771_v49 = vadd.f32 %v1262_v18, %v770_v43  ;;  %1042 = dma.vmem_to_hbm [thread:$0]  %s1035_s25, 1024, %s1037_s29, [#allocation4], %s1517_s1, %s1517_s1, %s1518_s26  }
 0x229   :  { %v1004_v48 = vsel %vm1001_vm13, %v1003_v34, %v999_v47 }
 0x22a   :  { %1029 = vst.msk [vmem:[#allocation17 + $0x38] sm:$0xff] %vm152_vm0, %v1004_v48  ;;  %v775_v14 = vsel %vm774_vm15, %v1262_v18, %v771_v49 }
 0x22b   :  { %v780_v20 = vsel %vm777_vm1, %v779_v51, %v775_v14 }
 0x22c   :  { %v821_v32 = vmul.f32 %v811_v53, %v780_v20 }
 0x22e   :  { %1021 = vst.msk [vmem:[#allocation15 + $0x38] sm:$0xff] %vm152_vm0, %v821_v32 }
 0x22f   :  { %1055 = dma.vmem_to_hbm [thread:$0]  %s1048_s4, 1024, %s1050_s11, [#allocation16], %s1517_s1, %s1517_s1, %s1518_s26  }
 0x230   :  { %1068 = dma.vmem_to_hbm [thread:$0]  %s1061_s13, 1024, %s1063_s15, [#allocation16], %s1517_s1, %s1517_s1, %s1518_s26  }
 0x231   :  { %1511 = dma.done.wait [#allocation4], 1024  }
 0x232   :  { %1512 = vsyncadd [#allocation4], 4294966272 }
 0x233   :  { %1513 = dma.done.wait [#allocation16], 2048  }
 0x234   :  { %1514 = vsyncadd [#allocation16], 4294965248 }
 0x235   :  { %1081 = vsyncpa [#allocation3], 1 }
 0x236   :  { %1082 = vsyncpa [#allocation6], 1 }
 0x237   :  { %1083 = vsyncpa [#allocation9], 1 }
 0x238   :  { %1084 = vsyncpa [#allocation12], 1 }
 0x239   :  { %1085 = vsyncpa [#allocation4], 1 }
 0x23a   :  { %1086 = vsyncpa [#allocation16], 1 }

</bundles_post_ra>
